<compile_context>
chip_gen: v6e
topology: v6e:2x2x1
jax: 0.10.0
libtpu: 0.0.40
codegen_flags: <defaults>
</compile_context>

<pallas_src>
import functools

import jax
import jax.numpy as jnp
from jax.experimental import pallas as pl
from jax.experimental.pallas import tpu as pltpu


_NEG_BIG = -1e30  # finite "-inf": NaN-safe for masked entries


# ----------------------------- Pallas kernel --------------------------------

def _flash_mha_kernel(x_q_ref, x_kv_ref, wq_ref, wkv_ref, wproj_ref, b_ref,
                      o_ref, q_scr, acc_scr, m_scr, l_scr, *,
                      num_heads, head_size, q_tile, kv_tile, scale):
    # x_q_ref:   (1, TQ, C)   bf16   rows of x for this q tile
    # x_kv_ref:  (1, TK, C)   bf16   rows of x for this kv tile
    # wq_ref:    (C, H*D)     bf16   fused per-head query weights
    # wkv_ref:   (C, 2*H*D)   bf16   fused [K | V] weights
    # wproj_ref: (H*D, C)     bf16   output projection (x @ W layout)
    # b_ref:     (1, C)       f32    projection bias
    # o_ref:     (1, TQ, C)   bf16
    # q_scr:     (TQ, H*D)    bf16   scaled Q for the current q tile
    # acc_scr:   (TQ, H*D)    f32    unnormalized per-head outputs (column slabs)
    # m_scr:     (H, TQ, 1)   f32    running max per head / q row
    # l_scr:     (H, TQ, 1)   f32    running denom per head / q row
    H, D = num_heads, head_size
    HD = H * D
    TQ, TK = q_tile, kv_tile

    qi = pl.program_id(1)
    ki = pl.program_id(2)
    q_start = qi * TQ
    kv_start = ki * TK

    # ---- per-(batch, q tile) init: compute scaled Q once, reset softmax state.
    @pl.when(ki == 0)
    def _init():
        xq = x_q_ref[0]                                              # (TQ, C)
        q = jnp.dot(xq, wq_ref[...], preferred_element_type=jnp.float32)
        q_scr[...] = (q * scale).astype(jnp.bfloat16)  # scale folded into Q
        m_scr[...] = jnp.full_like(m_scr, _NEG_BIG)
        l_scr[...] = jnp.zeros_like(l_scr)
        acc_scr[...] = jnp.zeros_like(acc_scr)

    # ---- causal block skipping: kv tiles strictly above the diagonal do nothing.
    @pl.when(kv_start <= q_start + TQ - 1)
    def _process():
        xkv = x_kv_ref[0]                                            # (TK, C)
        kv = jnp.dot(xkv, wkv_ref[...],
                     preferred_element_type=jnp.float32)             # (TK, 2HD)
        k_all = kv[:, :HD].astype(jnp.bfloat16)                      # cast once
        v_all = kv[:, HD:].astype(jnp.bfloat16)

        def _do_heads(masked):
            if masked:  # built only for diagonal tiles
                row = q_start + jax.lax.broadcasted_iota(jnp.int32, (TQ, TK), 0)
                col = kv_start + jax.lax.broadcasted_iota(jnp.int32, (TQ, TK), 1)
                keep = col <= row
            for h in range(H):
                sl = slice(h * D, (h + 1) * D)
                qh = q_scr[:, sl]                                    # (TQ, D) bf16
                kh = k_all[:, sl]                                    # (TK, D) bf16
                vh = v_all[:, sl]
                s = jax.lax.dot_general(                             # (TQ, TK) f32
                    qh, kh, (((1,), (1,)), ((), ())),
                    preferred_element_type=jnp.float32)
                if masked:
                    s = jnp.where(keep, s, _NEG_BIG)
                m_prev = m_scr[h]                                    # (TQ, 1)
                m_new = jnp.maximum(m_prev, jnp.max(s, axis=-1, keepdims=True))
                alpha = jnp.exp(m_prev - m_new)
                p = jnp.exp(s - m_new)                               # unnormalized
                l_scr[h] = alpha * l_scr[h] + jnp.sum(p, axis=-1, keepdims=True)
                acc_scr[:, sl] = alpha * acc_scr[:, sl] + jnp.dot(
                    p.astype(jnp.bfloat16), vh,
                    preferred_element_type=jnp.float32)
                m_scr[h] = m_new

        needs_mask = kv_start + TK - 1 > q_start

        @pl.when(needs_mask)
        def _masked():
            _do_heads(True)

        @pl.when(jnp.logical_not(needs_mask))
        def _unmasked():
            _do_heads(False)

    # ---- finalize: deferred softmax normalization + fused projection + bias.
    @pl.when(ki == pl.num_programs(2) - 1)
    def _finalize():
        for h in range(H):
            sl = slice(h * D, (h + 1) * D)
            inv = pl.reciprocal(l_scr[h], approx=True)               # EUP slot
            acc_scr[:, sl] = acc_scr[:, sl] * inv
        cat = acc_scr[...].astype(jnp.bfloat16)                      # (TQ, HD)
        y = jnp.dot(cat, wproj_ref[...],
                    preferred_element_type=jnp.float32) + b_ref[...]
        o_ref[...] = y[None].astype(o_ref.dtype)


# ------------------------------- wrapper -------------------------------------

def multi_head_attention(x, wk, wq, wv, w_proj, b_proj, *, q_tile, kv_tile):
    """x: (B, T, C); wk/wq/wv: (H, C, D); w_proj: (C, C) pre-transposed (in, out);
    b_proj: (1, C)."""
    B, T, C = x.shape
    H, _, D = wk.shape
    assert H * D == C, "concat of heads must match n_embd for the projection"
    assert T % q_tile == 0 and T % kv_tile == 0
    assert q_tile % 8 == 0 and kv_tile % 8 == 0
    scale = float(C) ** -0.5   # matches `* C ** (-0.5)` in the PyTorch Head
    HD = H * D
    nQ, nK = T // q_tile, T // kv_tile

    def _cat_heads(w):                      # (H, C, D) -> (C, H*D)
        return jnp.transpose(w, (1, 0, 2)).reshape(C, H * D)

    w_q = _cat_heads(wq)                                             # (C, HD)
    w_kv = jnp.concatenate([_cat_heads(wk), _cat_heads(wv)], axis=-1)  # (C, 2HD)

    x_bf = x.astype(jnp.bfloat16)
    w_q_bf = w_q.astype(jnp.bfloat16)
    w_kv_bf = w_kv.astype(jnp.bfloat16)
    w_proj_bf = w_proj.astype(jnp.bfloat16)
    b_f32 = b_proj.reshape(1, C).astype(jnp.float32)

    kernel = functools.partial(
        _flash_mha_kernel, num_heads=H, head_size=D,
        q_tile=q_tile, kv_tile=kv_tile, scale=scale)

    out = pl.pallas_call(
        kernel,
        out_shape=jax.ShapeDtypeStruct((B, T, C), jnp.bfloat16),
        grid=(B, nQ, nK),
        in_specs=[
            pl.BlockSpec((1, q_tile, C), lambda b, qi, ki: (b, qi, 0)),   # x for Q
            pl.BlockSpec((1, kv_tile, C), lambda b, qi, ki: (b, ki, 0)),  # x for K/V
            pl.BlockSpec((C, HD), lambda b, qi, ki: (0, 0)),
            pl.BlockSpec((C, 2 * HD), lambda b, qi, ki: (0, 0)),
            pl.BlockSpec((HD, C), lambda b, qi, ki: (0, 0)),
            pl.BlockSpec((1, C), lambda b, qi, ki: (0, 0)),
        ],
        out_specs=pl.BlockSpec((1, q_tile, C), lambda b, qi, ki: (b, qi, 0)),
        scratch_shapes=[
            pltpu.VMEM((q_tile, HD), jnp.bfloat16),   # q_scr
            pltpu.VMEM((q_tile, HD), jnp.float32),    # acc_scr
            pltpu.VMEM((H, q_tile, 1), jnp.float32),  # m_scr
            pltpu.VMEM((H, q_tile, 1), jnp.float32),  # l_scr
        ],
        compiler_params=pltpu.CompilerParams(
            dimension_semantics=("parallel", "parallel", "arbitrary"),
            vmem_limit_bytes=32 * 1024 * 1024),
    )(x_bf, x_bf, w_q_bf, w_kv_bf, w_proj_bf, b_f32)

    return out


# ----------------------------- pure-JAX reference ----------------------------

def _reference(x, wk, wq, wv, w_proj, b_proj):
    B, T, C = x.shape
    H, _, D = wk.shape
    scale = float(C) ** -0.5
    k = jnp.einsum('btc,hcd->bhtd', x, wk)
    q = jnp.einsum('btc,hcd->bhtd', x, wq)
    v = jnp.einsum('btc,hcd->bhtd', x, wv)
    wei = jnp.einsum('bhtd,bhsd->bhts', q, k) * scale
    mask = jnp.tril(jnp.ones((T, T), dtype=bool))
    wei = jnp.where(mask, wei, -jnp.inf)
    wei = jax.nn.softmax(wei, axis=-1)
    out = jnp.einsum('bhts,bhsd->bhtd', wei, v)
    cat = jnp.transpose(out, (0, 2, 1, 3)).reshape(B, T, H * D)
    return cat @ w_proj + b_proj


# ------------------------------- main ----------------------------------------

if __name__ == "__main__":
    # Small shapes consistent with the module: n_embd = num_heads * head_size.
    B, T = 2, 32
    n_embd = 32       # C
    head_size = 8     # D
    num_heads = 4     # H
    q_tile = kv_tile = 16   # 2x2 q/kv tiles: exercises diagonal-masked,
                            # fully-below-unmasked, and skipped tiles.

    key = jax.random.PRNGKey(0)
    kx, kk, kq, kv, kp, kb = jax.random.split(key, 6)

    x = jax.random.normal(kx, (B, T, n_embd), dtype=jnp.float32)

    # Per-head Linear(n_embd, head_size, bias=False) weights, pre-transposed
    # to (H, C, D) so the kernel does x @ W.
    wk = jax.random.normal(kk, (num_heads, n_embd, head_size), jnp.float32) * 0.05
    wq = jax.random.normal(kq, (num_heads, n_embd, head_size), jnp.float32) * 0.05
    wv = jax.random.normal(kv, (num_heads, n_embd, head_size), jnp.float32) * 0.05

    # proj = Linear(n_embd, n_embd): stored pre-transposed (in, out) + bias.
    w_proj = jax.random.normal(kp, (n_embd, n_embd), jnp.float32) * 0.05
    b_proj = (jax.random.normal(kb, (n_embd,), jnp.float32) * 0.05).reshape(1, n_embd)

    out = multi_head_attention(x, wk, wq, wv, w_proj, b_proj,
                               q_tile=q_tile, kv_tile=kv_tile)
    jax.block_until_ready(out)
    assert out.shape == (B, T, n_embd)

    ref = _reference(x, wk, wq, wv, w_proj, b_proj)
    err = float(jnp.max(jnp.abs(out.astype(jnp.float32) - ref)))
    assert err < 5e-2, f"max abs error {err} too large vs f32 reference"

    print("KERNEL_OK")
</pallas_src>

<mosaic_0001>
module attributes {stable_mosaic.version = 11 : i64} {
  func.func @_flash_mha_kernel(%arg0: i32, %arg1: i32, %arg2: i32, %arg3: memref<1x16x32xbf16, #tpu.memory_space<vmem>>, %arg4: memref<1x16x32xbf16, #tpu.memory_space<vmem>>, %arg5: memref<32x32xbf16, #tpu.memory_space<vmem>>, %arg6: memref<32x64xbf16, #tpu.memory_space<vmem>>, %arg7: memref<32x32xbf16, #tpu.memory_space<vmem>>, %arg8: memref<1x32xf32, #tpu.memory_space<vmem>>, %arg9: memref<1x16x32xbf16, #tpu.memory_space<vmem>>, %arg10: memref<16x32xbf16, #tpu.memory_space<vmem>>, %arg11: memref<16x32xf32, #tpu.memory_space<vmem>>, %arg12: memref<4x16x1xf32, #tpu.memory_space<vmem>>, %arg13: memref<4x16x1xf32, #tpu.memory_space<vmem>>) attributes {dimension_semantics = [#tpu.dimension_semantics<parallel>, #tpu.dimension_semantics<parallel>, #tpu.dimension_semantics<arbitrary>], iteration_bounds = array<i64: 2, 2, 2>, scalar_prefetch = 0 : i64, scratch_operands = 4 : i64, tpu.core_type = #tpu.core_type<tc>, window_params = [{transform_indices = @transform_0, window_bounds = array<i64: 1, 16, 32>}, {transform_indices = @transform_1, window_bounds = array<i64: 1, 16, 32>}, {pipeline_mode = #tpu.pipeline_mode<synchronous>, transform_indices = @transform_2, window_bounds = array<i64: 32, 32>}, {pipeline_mode = #tpu.pipeline_mode<synchronous>, transform_indices = @transform_3, window_bounds = array<i64: 32, 64>}, {pipeline_mode = #tpu.pipeline_mode<synchronous>, transform_indices = @transform_4, window_bounds = array<i64: 32, 32>}, {pipeline_mode = #tpu.pipeline_mode<synchronous>, transform_indices = @transform_5, window_bounds = array<i64: 1, 32>}, {transform_indices = @transform_6, window_bounds = array<i64: 1, 16, 32>}]} {
    %c16_i32 = arith.constant 16 : i32
    %0 = arith.muli %arg1, %c16_i32 : i32
    %c16_i32_0 = arith.constant 16 : i32
    %1 = arith.muli %arg2, %c16_i32_0 : i32
    %c0_i32 = arith.constant 0 : i32
    %2 = arith.cmpi eq, %arg2, %c0_i32 : i32
    %3 = arith.extui %2 : i1 to i32
    %c0_i32_1 = arith.constant 0 : i32
    %4 = arith.cmpi ne, %3, %c0_i32_1 : i32
    scf.if %4 {
      %c0 = arith.constant 0 : index
      %c0_6 = arith.constant 0 : index
      %c0_7 = arith.constant 0 : index
      %13 = vector.load %arg3[%c0, %c0_6, %c0_7] : memref<1x16x32xbf16, #tpu.memory_space<vmem>>, vector<1x16x32xbf16>
      %14 = vector.shape_cast %13 : vector<1x16x32xbf16> to vector<16x32xbf16>
      %c0_8 = arith.constant 0 : index
      %c0_9 = arith.constant 0 : index
      %15 = vector.load %arg5[%c0_8, %c0_9] : memref<32x32xbf16, #tpu.memory_space<vmem>>, vector<32x32xbf16>
      %cst = arith.constant dense<0.000000e+00> : vector<16x32xf32>
      %16 = tpu.matmul %14, %15, %cst {dimension_numbers = #tpu.dot_dimension_numbers<[1], [0], [0], [1], [0, 0, 1, 1], [], []>} : vector<16x32xbf16>, vector<32x32xbf16>, vector<16x32xf32> -> vector<16x32xf32>
      %cst_10 = arith.constant 0.176776692 : f32
      %17 = vector.broadcast %cst_10 : f32 to vector<16x32xf32>
      %18 = arith.mulf %16, %17 : vector<16x32xf32>
      %19 = arith.truncf %18 : vector<16x32xf32> to vector<16x32xbf16>
      %c0_11 = arith.constant 0 : index
      %c0_12 = arith.constant 0 : index
      %20 = vector.load %arg10[%c0_11, %c0_12] : memref<16x32xbf16, #tpu.memory_space<vmem>>, vector<16x32xbf16>
      tpu.vector_store %arg10[%c0_11, %c0_12], %19 {strides = array<i32>} : memref<16x32xbf16, #tpu.memory_space<vmem>>, vector<16x32xbf16>,
      %cst_13 = arith.constant -1.000000e+30 : f32
      %21 = vector.broadcast %cst_13 : f32 to vector<4x16x1xf32>
      %c0_14 = arith.constant 0 : index
      %c0_15 = arith.constant 0 : index
      %c0_16 = arith.constant 0 : index
      %22 = vector.load %arg12[%c0_14, %c0_15, %c0_16] : memref<4x16x1xf32, #tpu.memory_space<vmem>>, vector<4x16x1xf32>
      tpu.vector_store %arg12[%c0_14, %c0_15, %c0_16], %21 {strides = array<i32>} : memref<4x16x1xf32, #tpu.memory_space<vmem>>, vector<4x16x1xf32>,
      %cst_17 = arith.constant 0.000000e+00 : f32
      %23 = vector.broadcast %cst_17 : f32 to vector<4x16x1xf32>
      %c0_18 = arith.constant 0 : index
      %c0_19 = arith.constant 0 : index
      %c0_20 = arith.constant 0 : index
      %24 = vector.load %arg13[%c0_18, %c0_19, %c0_20] : memref<4x16x1xf32, #tpu.memory_space<vmem>>, vector<4x16x1xf32>
      tpu.vector_store %arg13[%c0_18, %c0_19, %c0_20], %23 {strides = array<i32>} : memref<4x16x1xf32, #tpu.memory_space<vmem>>, vector<4x16x1xf32>,
      %cst_21 = arith.constant 0.000000e+00 : f32
      %25 = vector.broadcast %cst_21 : f32 to vector<16x32xf32>
      %c0_22 = arith.constant 0 : index
      %c0_23 = arith.constant 0 : index
      %26 = vector.load %arg11[%c0_22, %c0_23] : memref<16x32xf32, #tpu.memory_space<vmem>>, vector<16x32xf32>
      tpu.vector_store %arg11[%c0_22, %c0_23], %25 {strides = array<i32>} : memref<16x32xf32, #tpu.memory_space<vmem>>, vector<16x32xf32>,
    } else {
    }
    %c16_i32_2 = arith.constant 16 : i32
    %5 = arith.addi %0, %c16_i32_2 : i32
    %c1_i32 = arith.constant 1 : i32
    %6 = arith.subi %5, %c1_i32 : i32
    %7 = arith.cmpi sle, %1, %6 : i32
    %8 = arith.extui %7 : i1 to i32
    %c0_i32_3 = arith.constant 0 : i32
    %9 = arith.cmpi ne, %8, %c0_i32_3 : i32
    scf.if %9 {
      %c0 = arith.constant 0 : index
      %c0_6 = arith.constant 0 : index
      %c0_7 = arith.constant 0 : index
      %13 = vector.load %arg4[%c0, %c0_6, %c0_7] : memref<1x16x32xbf16, #tpu.memory_space<vmem>>, vector<1x16x32xbf16>
      %14 = vector.shape_cast %13 : vector<1x16x32xbf16> to vector<16x32xbf16>
      %c0_8 = arith.constant 0 : index
      %c0_9 = arith.constant 0 : index
      %15 = vector.load %arg6[%c0_8, %c0_9] : memref<32x64xbf16, #tpu.memory_space<vmem>>, vector<32x64xbf16>
      %cst = arith.constant dense<0.000000e+00> : vector<16x64xf32>
      %16 = tpu.matmul %14, %15, %cst {dimension_numbers = #tpu.dot_dimension_numbers<[1], [0], [0], [1], [0, 0, 1, 1], [], []>} : vector<16x32xbf16>, vector<32x64xbf16>, vector<16x64xf32> -> vector<16x64xf32>
      %17 = vector.extract_strided_slice %16 {offsets = [0, 0], sizes = [16, 32], strides = [1, 1]} : vector<16x64xf32> to vector<16x32xf32>
      %18 = arith.truncf %17 : vector<16x32xf32> to vector<16x32xbf16>
      %19 = vector.extract_strided_slice %16 {offsets = [0, 32], sizes = [16, 32], strides = [1, 1]} : vector<16x64xf32> to vector<16x32xf32>
      %20 = arith.truncf %19 : vector<16x32xf32> to vector<16x32xbf16>
      %c16_i32_10 = arith.constant 16 : i32
      %21 = arith.addi %1, %c16_i32_10 : i32
      %c1_i32_11 = arith.constant 1 : i32
      %22 = arith.subi %21, %c1_i32_11 : i32
      %23 = arith.cmpi sgt, %22, %0 : i32
      %24 = arith.extui %23 : i1 to i32
      %c0_i32_12 = arith.constant 0 : i32
      %25 = arith.cmpi ne, %24, %c0_i32_12 : i32
      scf.if %25 {
        %29 = tpu.iota {dimensions = array<i32: 0>} : vector<16x16xi32>
        %30 = vector.broadcast %0 : i32 to vector<16x16xi32>
        %31 = arith.addi %30, %29 : vector<16x16xi32>
        %32 = tpu.iota {dimensions = array<i32: 1>} : vector<16x16xi32>
        %33 = vector.broadcast %1 : i32 to vector<16x16xi32>
        %34 = arith.addi %33, %32 : vector<16x16xi32>
        %35 = arith.cmpi sle, %34, %31 : vector<16x16xi32>
        %c0_14 = arith.constant 0 : index
        %c0_15 = arith.constant 0 : index
        %36 = vector.load %arg10[%c0_14, %c0_15] : memref<16x32xbf16, #tpu.memory_space<vmem>>, vector<16x8xbf16>
        %37 = vector.extract_strided_slice %18 {offsets = [0, 0], sizes = [16, 8], strides = [1, 1]} : vector<16x32xbf16> to vector<16x8xbf16>
        %38 = vector.extract_strided_slice %20 {offsets = [0, 0], sizes = [16, 8], strides = [1, 1]} : vector<16x32xbf16> to vector<16x8xbf16>
        %cst_16 = arith.constant dense<0.000000e+00> : vector<16x16xf32>
        %39 = tpu.matmul %36, %37, %cst_16 {dimension_numbers = #tpu.dot_dimension_numbers<[1], [1], [0], [0], [0, 0, 1, 0], [], []>} : vector<16x8xbf16>, vector<16x8xbf16>, vector<16x16xf32> -> vector<16x16xf32>
        %cst_17 = arith.constant -1.000000e+30 : f32
        %40 = vector.broadcast %cst_17 : f32 to vector<16x16xf32>
        %41 = arith.select %35, %39, %40 : vector<16x16xi1>, vector<16x16xf32>
        %c0_18 = arith.constant 0 : index
        %c0_19 = arith.constant 0 : index
        %c0_20 = arith.constant 0 : index
        %42 = vector.load %arg12[%c0_18, %c0_19, %c0_20] : memref<4x16x1xf32, #tpu.memory_space<vmem>>, vector<1x16x1xf32>
        %43 = vector.shape_cast %42 : vector<1x16x1xf32> to vector<16x1xf32>
        %cst_21 = arith.constant dense<0xFF800000> : vector<16xf32>
        %44 = vector.multi_reduction <maximumf>, %41, %cst_21 [1] : vector<16x16xf32> to vector<16xf32>
        %45 = vector.shape_cast %44 : vector<16xf32> to vector<16x1xf32>
        %46 = arith.maximumf %43, %45 : vector<16x1xf32>
        %47 = arith.subf %43, %46 : vector<16x1xf32>
        %48 = math.exp %47 : vector<16x1xf32>
        %49 = vector.broadcast %46 : vector<16x1xf32> to vector<16x16xf32>
        %50 = arith.subf %41, %49 : vector<16x16xf32>
        %51 = math.exp %50 : vector<16x16xf32>
        %c0_22 = arith.constant 0 : index
        %c0_23 = arith.constant 0 : index
        %c0_24 = arith.constant 0 : index
        %52 = vector.load %arg13[%c0_22, %c0_23, %c0_24] : memref<4x16x1xf32, #tpu.memory_space<vmem>>, vector<1x16x1xf32>
        %53 = vector.shape_cast %52 : vector<1x16x1xf32> to vector<16x1xf32>
        %54 = arith.mulf %48, %53 : vector<16x1xf32>
        %cst_25 = arith.constant dense<0.000000e+00> : vector<16xf32>
        %55 = vector.multi_reduction <add>, %51, %cst_25 [1] : vector<16x16xf32> to vector<16xf32>
        %56 = vector.shape_cast %55 : vector<16xf32> to vector<16x1xf32>
        %57 = arith.addf %54, %56 : vector<16x1xf32>
        %c0_26 = arith.constant 0 : index
        %c0_27 = arith.constant 0 : index
        %c0_28 = arith.constant 0 : index
        %58 = vector.load %arg13[%c0_26, %c0_27, %c0_28] : memref<4x16x1xf32, #tpu.memory_space<vmem>>, vector<1x16x1xf32>
        %59 = vector.shape_cast %58 : vector<1x16x1xf32> to vector<16x1xf32>
        %60 = vector.shape_cast %57 : vector<16x1xf32> to vector<1x16x1xf32>
        tpu.vector_store %arg13[%c0_26, %c0_27, %c0_28], %60 {strides = array<i32>} : memref<4x16x1xf32, #tpu.memory_space<vmem>>, vector<1x16x1xf32>,
        %c0_29 = arith.constant 0 : index
        %c0_30 = arith.constant 0 : index
        %61 = vector.load %arg11[%c0_29, %c0_30] : memref<16x32xf32, #tpu.memory_space<vmem>>, vector<16x8xf32>
        %62 = vector.broadcast %48 : vector<16x1xf32> to vector<16x8xf32>
        %63 = arith.mulf %62, %61 : vector<16x8xf32>
        %64 = arith.truncf %51 : vector<16x16xf32> to vector<16x16xbf16>
        %cst_31 = arith.constant dense<0.000000e+00> : vector<16x8xf32>
        %65 = tpu.matmul %64, %38, %cst_31 {dimension_numbers = #tpu.dot_dimension_numbers<[1], [0], [0], [1], [0, 0, 1, 1], [], []>} : vector<16x16xbf16>, vector<16x8xbf16>, vector<16x8xf32> -> vector<16x8xf32>
        %66 = arith.addf %63, %65 : vector<16x8xf32>
        %c0_32 = arith.constant 0 : index
        %c0_33 = arith.constant 0 : index
        %67 = vector.load %arg11[%c0_32, %c0_33] : memref<16x32xf32, #tpu.memory_space<vmem>>, vector<16x8xf32>
        tpu.vector_store %arg11[%c0_32, %c0_33], %66 {strides = array<i32>} : memref<16x32xf32, #tpu.memory_space<vmem>>, vector<16x8xf32>,
        %c0_34 = arith.constant 0 : index
        %c0_35 = arith.constant 0 : index
        %c0_36 = arith.constant 0 : index
        %68 = vector.load %arg12[%c0_34, %c0_35, %c0_36] : memref<4x16x1xf32, #tpu.memory_space<vmem>>, vector<1x16x1xf32>
        %69 = vector.shape_cast %68 : vector<1x16x1xf32> to vector<16x1xf32>
        %70 = vector.shape_cast %46 : vector<16x1xf32> to vector<1x16x1xf32>
        tpu.vector_store %arg12[%c0_34, %c0_35, %c0_36], %70 {strides = array<i32>} : memref<4x16x1xf32, #tpu.memory_space<vmem>>, vector<1x16x1xf32>,
        %c0_37 = arith.constant 0 : index
        %c8 = arith.constant 8 : index
        %71 = vector.load %arg10[%c0_37, %c8] : memref<16x32xbf16, #tpu.memory_space<vmem>>, vector<16x8xbf16>
        %72 = vector.extract_strided_slice %18 {offsets = [0, 8], sizes = [16, 8], strides = [1, 1]} : vector<16x32xbf16> to vector<16x8xbf16>
        %73 = vector.extract_strided_slice %20 {offsets = [0, 8], sizes = [16, 8], strides = [1, 1]} : vector<16x32xbf16> to vector<16x8xbf16>
        %cst_38 = arith.constant dense<0.000000e+00> : vector<16x16xf32>
        %74 = tpu.matmul %71, %72, %cst_38 {dimension_numbers = #tpu.dot_dimension_numbers<[1], [1], [0], [0], [0, 0, 1, 0], [], []>} : vector<16x8xbf16>, vector<16x8xbf16>, vector<16x16xf32> -> vector<16x16xf32>
        %cst_39 = arith.constant -1.000000e+30 : f32
        %75 = vector.broadcast %cst_39 : f32 to vector<16x16xf32>
        %76 = arith.select %35, %74, %75 : vector<16x16xi1>, vector<16x16xf32>
        %c1 = arith.constant 1 : index
        %c0_40 = arith.constant 0 : index
        %c0_41 = arith.constant 0 : index
        %77 = vector.load %arg12[%c1, %c0_40, %c0_41] : memref<4x16x1xf32, #tpu.memory_space<vmem>>, vector<1x16x1xf32>
        %78 = vector.shape_cast %77 : vector<1x16x1xf32> to vector<16x1xf32>
        %cst_42 = arith.constant dense<0xFF800000> : vector<16xf32>
        %79 = vector.multi_reduction <maximumf>, %76, %cst_42 [1] : vector<16x16xf32> to vector<16xf32>
        %80 = vector.shape_cast %79 : vector<16xf32> to vector<16x1xf32>
        %81 = arith.maximumf %78, %80 : vector<16x1xf32>
        %82 = arith.subf %78, %81 : vector<16x1xf32>
        %83 = math.exp %82 : vector<16x1xf32>
        %84 = vector.broadcast %81 : vector<16x1xf32> to vector<16x16xf32>
        %85 = arith.subf %76, %84 : vector<16x16xf32>
        %86 = math.exp %85 : vector<16x16xf32>
        %c1_43 = arith.constant 1 : index
        %c0_44 = arith.constant 0 : index
        %c0_45 = arith.constant 0 : index
        %87 = vector.load %arg13[%c1_43, %c0_44, %c0_45] : memref<4x16x1xf32, #tpu.memory_space<vmem>>, vector<1x16x1xf32>
        %88 = vector.shape_cast %87 : vector<1x16x1xf32> to vector<16x1xf32>
        %89 = arith.mulf %83, %88 : vector<16x1xf32>
        %cst_46 = arith.constant dense<0.000000e+00> : vector<16xf32>
        %90 = vector.multi_reduction <add>, %86, %cst_46 [1] : vector<16x16xf32> to vector<16xf32>
        %91 = vector.shape_cast %90 : vector<16xf32> to vector<16x1xf32>
        %92 = arith.addf %89, %91 : vector<16x1xf32>
        %c1_47 = arith.constant 1 : index
        %c0_48 = arith.constant 0 : index
        %c0_49 = arith.constant 0 : index
        %93 = vector.load %arg13[%c1_47, %c0_48, %c0_49] : memref<4x16x1xf32, #tpu.memory_space<vmem>>, vector<1x16x1xf32>
        %94 = vector.shape_cast %93 : vector<1x16x1xf32> to vector<16x1xf32>
        %95 = vector.shape_cast %92 : vector<16x1xf32> to vector<1x16x1xf32>
        tpu.vector_store %arg13[%c1_47, %c0_48, %c0_49], %95 {strides = array<i32>} : memref<4x16x1xf32, #tpu.memory_space<vmem>>, vector<1x16x1xf32>,
        %c0_50 = arith.constant 0 : index
        %c8_51 = arith.constant 8 : index
        %96 = vector.load %arg11[%c0_50, %c8_51] : memref<16x32xf32, #tpu.memory_space<vmem>>, vector<16x8xf32>
        %97 = vector.broadcast %83 : vector<16x1xf32> to vector<16x8xf32>
        %98 = arith.mulf %97, %96 : vector<16x8xf32>
        %99 = arith.truncf %86 : vector<16x16xf32> to vector<16x16xbf16>
        %cst_52 = arith.constant dense<0.000000e+00> : vector<16x8xf32>
        %100 = tpu.matmul %99, %73, %cst_52 {dimension_numbers = #tpu.dot_dimension_numbers<[1], [0], [0], [1], [0, 0, 1, 1], [], []>} : vector<16x16xbf16>, vector<16x8xbf16>, vector<16x8xf32> -> vector<16x8xf32>
        %101 = arith.addf %98, %100 : vector<16x8xf32>
        %c0_53 = arith.constant 0 : index
        %c8_54 = arith.constant 8 : index
        %102 = vector.load %arg11[%c0_53, %c8_54] : memref<16x32xf32, #tpu.memory_space<vmem>>, vector<16x8xf32>
        tpu.vector_store %arg11[%c0_53, %c8_54], %101 {strides = array<i32>} : memref<16x32xf32, #tpu.memory_space<vmem>>, vector<16x8xf32>,
        %c1_55 = arith.constant 1 : index
        %c0_56 = arith.constant 0 : index
        %c0_57 = arith.constant 0 : index
        %103 = vector.load %arg12[%c1_55, %c0_56, %c0_57] : memref<4x16x1xf32, #tpu.memory_space<vmem>>, vector<1x16x1xf32>
        %104 = vector.shape_cast %103 : vector<1x16x1xf32> to vector<16x1xf32>
        %105 = vector.shape_cast %81 : vector<16x1xf32> to vector<1x16x1xf32>
        tpu.vector_store %arg12[%c1_55, %c0_56, %c0_57], %105 {strides = array<i32>} : memref<4x16x1xf32, #tpu.memory_space<vmem>>, vector<1x16x1xf32>,
        %c0_58 = arith.constant 0 : index
        %c16 = arith.constant 16 : index
        %106 = vector.load %arg10[%c0_58, %c16] : memref<16x32xbf16, #tpu.memory_space<vmem>>, vector<16x8xbf16>
        %107 = vector.extract_strided_slice %18 {offsets = [0, 16], sizes = [16, 8], strides = [1, 1]} : vector<16x32xbf16> to vector<16x8xbf16>
        %108 = vector.extract_strided_slice %20 {offsets = [0, 16], sizes = [16, 8], strides = [1, 1]} : vector<16x32xbf16> to vector<16x8xbf16>
        %cst_59 = arith.constant dense<0.000000e+00> : vector<16x16xf32>
        %109 = tpu.matmul %106, %107, %cst_59 {dimension_numbers = #tpu.dot_dimension_numbers<[1], [1], [0], [0], [0, 0, 1, 0], [], []>} : vector<16x8xbf16>, vector<16x8xbf16>, vector<16x16xf32> -> vector<16x16xf32>
        %cst_60 = arith.constant -1.000000e+30 : f32
        %110 = vector.broadcast %cst_60 : f32 to vector<16x16xf32>
        %111 = arith.select %35, %109, %110 : vector<16x16xi1>, vector<16x16xf32>
        %c2 = arith.constant 2 : index
        %c0_61 = arith.constant 0 : index
        %c0_62 = arith.constant 0 : index
        %112 = vector.load %arg12[%c2, %c0_61, %c0_62] : memref<4x16x1xf32, #tpu.memory_space<vmem>>, vector<1x16x1xf32>
        %113 = vector.shape_cast %112 : vector<1x16x1xf32> to vector<16x1xf32>
        %cst_63 = arith.constant dense<0xFF800000> : vector<16xf32>
        %114 = vector.multi_reduction <maximumf>, %111, %cst_63 [1] : vector<16x16xf32> to vector<16xf32>
        %115 = vector.shape_cast %114 : vector<16xf32> to vector<16x1xf32>
        %116 = arith.maximumf %113, %115 : vector<16x1xf32>
        %117 = arith.subf %113, %116 : vector<16x1xf32>
        %118 = math.exp %117 : vector<16x1xf32>
        %119 = vector.broadcast %116 : vector<16x1xf32> to vector<16x16xf32>
        %120 = arith.subf %111, %119 : vector<16x16xf32>
        %121 = math.exp %120 : vector<16x16xf32>
        %c2_64 = arith.constant 2 : index
        %c0_65 = arith.constant 0 : index
        %c0_66 = arith.constant 0 : index
        %122 = vector.load %arg13[%c2_64, %c0_65, %c0_66] : memref<4x16x1xf32, #tpu.memory_space<vmem>>, vector<1x16x1xf32>
        %123 = vector.shape_cast %122 : vector<1x16x1xf32> to vector<16x1xf32>
        %124 = arith.mulf %118, %123 : vector<16x1xf32>
        %cst_67 = arith.constant dense<0.000000e+00> : vector<16xf32>
        %125 = vector.multi_reduction <add>, %121, %cst_67 [1] : vector<16x16xf32> to vector<16xf32>
        %126 = vector.shape_cast %125 : vector<16xf32> to vector<16x1xf32>
        %127 = arith.addf %124, %126 : vector<16x1xf32>
        %c2_68 = arith.constant 2 : index
        %c0_69 = arith.constant 0 : index
        %c0_70 = arith.constant 0 : index
        %128 = vector.load %arg13[%c2_68, %c0_69, %c0_70] : memref<4x16x1xf32, #tpu.memory_space<vmem>>, vector<1x16x1xf32>
        %129 = vector.shape_cast %128 : vector<1x16x1xf32> to vector<16x1xf32>
        %130 = vector.shape_cast %127 : vector<16x1xf32> to vector<1x16x1xf32>
        tpu.vector_store %arg13[%c2_68, %c0_69, %c0_70], %130 {strides = array<i32>} : memref<4x16x1xf32, #tpu.memory_space<vmem>>, vector<1x16x1xf32>,
        %c0_71 = arith.constant 0 : index
        %c16_72 = arith.constant 16 : index
        %131 = vector.load %arg11[%c0_71, %c16_72] : memref<16x32xf32, #tpu.memory_space<vmem>>, vector<16x8xf32>
        %132 = vector.broadcast %118 : vector<16x1xf32> to vector<16x8xf32>
        %133 = arith.mulf %132, %131 : vector<16x8xf32>
        %134 = arith.truncf %121 : vector<16x16xf32> to vector<16x16xbf16>
        %cst_73 = arith.constant dense<0.000000e+00> : vector<16x8xf32>
        %135 = tpu.matmul %134, %108, %cst_73 {dimension_numbers = #tpu.dot_dimension_numbers<[1], [0], [0], [1], [0, 0, 1, 1], [], []>} : vector<16x16xbf16>, vector<16x8xbf16>, vector<16x8xf32> -> vector<16x8xf32>
        %136 = arith.addf %133, %135 : vector<16x8xf32>
        %c0_74 = arith.constant 0 : index
        %c16_75 = arith.constant 16 : index
        %137 = vector.load %arg11[%c0_74, %c16_75] : memref<16x32xf32, #tpu.memory_space<vmem>>, vector<16x8xf32>
        tpu.vector_store %arg11[%c0_74, %c16_75], %136 {strides = array<i32>} : memref<16x32xf32, #tpu.memory_space<vmem>>, vector<16x8xf32>,
        %c2_76 = arith.constant 2 : index
        %c0_77 = arith.constant 0 : index
        %c0_78 = arith.constant 0 : index
        %138 = vector.load %arg12[%c2_76, %c0_77, %c0_78] : memref<4x16x1xf32, #tpu.memory_space<vmem>>, vector<1x16x1xf32>
        %139 = vector.shape_cast %138 : vector<1x16x1xf32> to vector<16x1xf32>
        %140 = vector.shape_cast %116 : vector<16x1xf32> to vector<1x16x1xf32>
        tpu.vector_store %arg12[%c2_76, %c0_77, %c0_78], %140 {strides = array<i32>} : memref<4x16x1xf32, #tpu.memory_space<vmem>>, vector<1x16x1xf32>,
        %c0_79 = arith.constant 0 : index
        %c24 = arith.constant 24 : index
        %141 = vector.load %arg10[%c0_79, %c24] : memref<16x32xbf16, #tpu.memory_space<vmem>>, vector<16x8xbf16>
        %142 = vector.extract_strided_slice %18 {offsets = [0, 24], sizes = [16, 8], strides = [1, 1]} : vector<16x32xbf16> to vector<16x8xbf16>
        %143 = vector.extract_strided_slice %20 {offsets = [0, 24], sizes = [16, 8], strides = [1, 1]} : vector<16x32xbf16> to vector<16x8xbf16>
        %cst_80 = arith.constant dense<0.000000e+00> : vector<16x16xf32>
        %144 = tpu.matmul %141, %142, %cst_80 {dimension_numbers = #tpu.dot_dimension_numbers<[1], [1], [0], [0], [0, 0, 1, 0], [], []>} : vector<16x8xbf16>, vector<16x8xbf16>, vector<16x16xf32> -> vector<16x16xf32>
        %cst_81 = arith.constant -1.000000e+30 : f32
        %145 = vector.broadcast %cst_81 : f32 to vector<16x16xf32>
        %146 = arith.select %35, %144, %145 : vector<16x16xi1>, vector<16x16xf32>
        %c3 = arith.constant 3 : index
        %c0_82 = arith.constant 0 : index
        %c0_83 = arith.constant 0 : index
        %147 = vector.load %arg12[%c3, %c0_82, %c0_83] : memref<4x16x1xf32, #tpu.memory_space<vmem>>, vector<1x16x1xf32>
        %148 = vector.shape_cast %147 : vector<1x16x1xf32> to vector<16x1xf32>
        %cst_84 = arith.constant dense<0xFF800000> : vector<16xf32>
        %149 = vector.multi_reduction <maximumf>, %146, %cst_84 [1] : vector<16x16xf32> to vector<16xf32>
        %150 = vector.shape_cast %149 : vector<16xf32> to vector<16x1xf32>
        %151 = arith.maximumf %148, %150 : vector<16x1xf32>
        %152 = arith.subf %148, %151 : vector<16x1xf32>
        %153 = math.exp %152 : vector<16x1xf32>
        %154 = vector.broadcast %151 : vector<16x1xf32> to vector<16x16xf32>
        %155 = arith.subf %146, %154 : vector<16x16xf32>
        %156 = math.exp %155 : vector<16x16xf32>
        %c3_85 = arith.constant 3 : index
        %c0_86 = arith.constant 0 : index
        %c0_87 = arith.constant 0 : index
        %157 = vector.load %arg13[%c3_85, %c0_86, %c0_87] : memref<4x16x1xf32, #tpu.memory_space<vmem>>, vector<1x16x1xf32>
        %158 = vector.shape_cast %157 : vector<1x16x1xf32> to vector<16x1xf32>
        %159 = arith.mulf %153, %158 : vector<16x1xf32>
        %cst_88 = arith.constant dense<0.000000e+00> : vector<16xf32>
        %160 = vector.multi_reduction <add>, %156, %cst_88 [1] : vector<16x16xf32> to vector<16xf32>
        %161 = vector.shape_cast %160 : vector<16xf32> to vector<16x1xf32>
        %162 = arith.addf %159, %161 : vector<16x1xf32>
        %c3_89 = arith.constant 3 : index
        %c0_90 = arith.constant 0 : index
        %c0_91 = arith.constant 0 : index
        %163 = vector.load %arg13[%c3_89, %c0_90, %c0_91] : memref<4x16x1xf32, #tpu.memory_space<vmem>>, vector<1x16x1xf32>
        %164 = vector.shape_cast %163 : vector<1x16x1xf32> to vector<16x1xf32>
        %165 = vector.shape_cast %162 : vector<16x1xf32> to vector<1x16x1xf32>
        tpu.vector_store %arg13[%c3_89, %c0_90, %c0_91], %165 {strides = array<i32>} : memref<4x16x1xf32, #tpu.memory_space<vmem>>, vector<1x16x1xf32>,
        %c0_92 = arith.constant 0 : index
        %c24_93 = arith.constant 24 : index
        %166 = vector.load %arg11[%c0_92, %c24_93] : memref<16x32xf32, #tpu.memory_space<vmem>>, vector<16x8xf32>
        %167 = vector.broadcast %153 : vector<16x1xf32> to vector<16x8xf32>
        %168 = arith.mulf %167, %166 : vector<16x8xf32>
        %169 = arith.truncf %156 : vector<16x16xf32> to vector<16x16xbf16>
        %cst_94 = arith.constant dense<0.000000e+00> : vector<16x8xf32>
        %170 = tpu.matmul %169, %143, %cst_94 {dimension_numbers = #tpu.dot_dimension_numbers<[1], [0], [0], [1], [0, 0, 1, 1], [], []>} : vector<16x16xbf16>, vector<16x8xbf16>, vector<16x8xf32> -> vector<16x8xf32>
        %171 = arith.addf %168, %170 : vector<16x8xf32>
        %c0_95 = arith.constant 0 : index
        %c24_96 = arith.constant 24 : index
        %172 = vector.load %arg11[%c0_95, %c24_96] : memref<16x32xf32, #tpu.memory_space<vmem>>, vector<16x8xf32>
        tpu.vector_store %arg11[%c0_95, %c24_96], %171 {strides = array<i32>} : memref<16x32xf32, #tpu.memory_space<vmem>>, vector<16x8xf32>,
        %c3_97 = arith.constant 3 : index
        %c0_98 = arith.constant 0 : index
        %c0_99 = arith.constant 0 : index
        %173 = vector.load %arg12[%c3_97, %c0_98, %c0_99] : memref<4x16x1xf32, #tpu.memory_space<vmem>>, vector<1x16x1xf32>
        %174 = vector.shape_cast %173 : vector<1x16x1xf32> to vector<16x1xf32>
        %175 = vector.shape_cast %151 : vector<16x1xf32> to vector<1x16x1xf32>
        tpu.vector_store %arg12[%c3_97, %c0_98, %c0_99], %175 {strides = array<i32>} : memref<4x16x1xf32, #tpu.memory_space<vmem>>, vector<1x16x1xf32>,
      } else {
      }
      %true = arith.constant true
      %26 = arith.xori %23, %true : i1
      %27 = arith.extui %26 : i1 to i32
      %c0_i32_13 = arith.constant 0 : i32
      %28 = arith.cmpi ne, %27, %c0_i32_13 : i32
      scf.if %28 {
        %c0_14 = arith.constant 0 : index
        %c0_15 = arith.constant 0 : index
        %29 = vector.load %arg10[%c0_14, %c0_15] : memref<16x32xbf16, #tpu.memory_space<vmem>>, vector<16x8xbf16>
        %30 = vector.extract_strided_slice %18 {offsets = [0, 0], sizes = [16, 8], strides = [1, 1]} : vector<16x32xbf16> to vector<16x8xbf16>
        %31 = vector.extract_strided_slice %20 {offsets = [0, 0], sizes = [16, 8], strides = [1, 1]} : vector<16x32xbf16> to vector<16x8xbf16>
        %cst_16 = arith.constant dense<0.000000e+00> : vector<16x16xf32>
        %32 = tpu.matmul %29, %30, %cst_16 {dimension_numbers = #tpu.dot_dimension_numbers<[1], [1], [0], [0], [0, 0, 1, 0], [], []>} : vector<16x8xbf16>, vector<16x8xbf16>, vector<16x16xf32> -> vector<16x16xf32>
        %c0_17 = arith.constant 0 : index
        %c0_18 = arith.constant 0 : index
        %c0_19 = arith.constant 0 : index
        %33 = vector.load %arg12[%c0_17, %c0_18, %c0_19] : memref<4x16x1xf32, #tpu.memory_space<vmem>>, vector<1x16x1xf32>
        %34 = vector.shape_cast %33 : vector<1x16x1xf32> to vector<16x1xf32>
        %cst_20 = arith.constant dense<0xFF800000> : vector<16xf32>
        %35 = vector.multi_reduction <maximumf>, %32, %cst_20 [1] : vector<16x16xf32> to vector<16xf32>
        %36 = vector.shape_cast %35 : vector<16xf32> to vector<16x1xf32>
        %37 = arith.maximumf %34, %36 : vector<16x1xf32>
        %38 = arith.subf %34, %37 : vector<16x1xf32>
        %39 = math.exp %38 : vector<16x1xf32>
        %40 = vector.broadcast %37 : vector<16x1xf32> to vector<16x16xf32>
        %41 = arith.subf %32, %40 : vector<16x16xf32>
        %42 = math.exp %41 : vector<16x16xf32>
        %c0_21 = arith.constant 0 : index
        %c0_22 = arith.constant 0 : index
        %c0_23 = arith.constant 0 : index
        %43 = vector.load %arg13[%c0_21, %c0_22, %c0_23] : memref<4x16x1xf32, #tpu.memory_space<vmem>>, vector<1x16x1xf32>
        %44 = vector.shape_cast %43 : vector<1x16x1xf32> to vector<16x1xf32>
        %45 = arith.mulf %39, %44 : vector<16x1xf32>
        %cst_24 = arith.constant dense<0.000000e+00> : vector<16xf32>
        %46 = vector.multi_reduction <add>, %42, %cst_24 [1] : vector<16x16xf32> to vector<16xf32>
        %47 = vector.shape_cast %46 : vector<16xf32> to vector<16x1xf32>
        %48 = arith.addf %45, %47 : vector<16x1xf32>
        %c0_25 = arith.constant 0 : index
        %c0_26 = arith.constant 0 : index
        %c0_27 = arith.constant 0 : index
        %49 = vector.load %arg13[%c0_25, %c0_26, %c0_27] : memref<4x16x1xf32, #tpu.memory_space<vmem>>, vector<1x16x1xf32>
        %50 = vector.shape_cast %49 : vector<1x16x1xf32> to vector<16x1xf32>
        %51 = vector.shape_cast %48 : vector<16x1xf32> to vector<1x16x1xf32>
        tpu.vector_store %arg13[%c0_25, %c0_26, %c0_27], %51 {strides = array<i32>} : memref<4x16x1xf32, #tpu.memory_space<vmem>>, vector<1x16x1xf32>,
        %c0_28 = arith.constant 0 : index
        %c0_29 = arith.constant 0 : index
        %52 = vector.load %arg11[%c0_28, %c0_29] : memref<16x32xf32, #tpu.memory_space<vmem>>, vector<16x8xf32>
        %53 = vector.broadcast %39 : vector<16x1xf32> to vector<16x8xf32>
        %54 = arith.mulf %53, %52 : vector<16x8xf32>
        %55 = arith.truncf %42 : vector<16x16xf32> to vector<16x16xbf16>
        %cst_30 = arith.constant dense<0.000000e+00> : vector<16x8xf32>
        %56 = tpu.matmul %55, %31, %cst_30 {dimension_numbers = #tpu.dot_dimension_numbers<[1], [0], [0], [1], [0, 0, 1, 1], [], []>} : vector<16x16xbf16>, vector<16x8xbf16>, vector<16x8xf32> -> vector<16x8xf32>
        %57 = arith.addf %54, %56 : vector<16x8xf32>
        %c0_31 = arith.constant 0 : index
        %c0_32 = arith.constant 0 : index
        %58 = vector.load %arg11[%c0_31, %c0_32] : memref<16x32xf32, #tpu.memory_space<vmem>>, vector<16x8xf32>
        tpu.vector_store %arg11[%c0_31, %c0_32], %57 {strides = array<i32>} : memref<16x32xf32, #tpu.memory_space<vmem>>, vector<16x8xf32>,
        %c0_33 = arith.constant 0 : index
        %c0_34 = arith.constant 0 : index
        %c0_35 = arith.constant 0 : index
        %59 = vector.load %arg12[%c0_33, %c0_34, %c0_35] : memref<4x16x1xf32, #tpu.memory_space<vmem>>, vector<1x16x1xf32>
        %60 = vector.shape_cast %59 : vector<1x16x1xf32> to vector<16x1xf32>
        %61 = vector.shape_cast %37 : vector<16x1xf32> to vector<1x16x1xf32>
        tpu.vector_store %arg12[%c0_33, %c0_34, %c0_35], %61 {strides = array<i32>} : memref<4x16x1xf32, #tpu.memory_space<vmem>>, vector<1x16x1xf32>,
        %c0_36 = arith.constant 0 : index
        %c8 = arith.constant 8 : index
        %62 = vector.load %arg10[%c0_36, %c8] : memref<16x32xbf16, #tpu.memory_space<vmem>>, vector<16x8xbf16>
        %63 = vector.extract_strided_slice %18 {offsets = [0, 8], sizes = [16, 8], strides = [1, 1]} : vector<16x32xbf16> to vector<16x8xbf16>
        %64 = vector.extract_strided_slice %20 {offsets = [0, 8], sizes = [16, 8], strides = [1, 1]} : vector<16x32xbf16> to vector<16x8xbf16>
        %cst_37 = arith.constant dense<0.000000e+00> : vector<16x16xf32>
        %65 = tpu.matmul %62, %63, %cst_37 {dimension_numbers = #tpu.dot_dimension_numbers<[1], [1], [0], [0], [0, 0, 1, 0], [], []>} : vector<16x8xbf16>, vector<16x8xbf16>, vector<16x16xf32> -> vector<16x16xf32>
        %c1 = arith.constant 1 : index
        %c0_38 = arith.constant 0 : index
        %c0_39 = arith.constant 0 : index
        %66 = vector.load %arg12[%c1, %c0_38, %c0_39] : memref<4x16x1xf32, #tpu.memory_space<vmem>>, vector<1x16x1xf32>
        %67 = vector.shape_cast %66 : vector<1x16x1xf32> to vector<16x1xf32>
        %cst_40 = arith.constant dense<0xFF800000> : vector<16xf32>
        %68 = vector.multi_reduction <maximumf>, %65, %cst_40 [1] : vector<16x16xf32> to vector<16xf32>
        %69 = vector.shape_cast %68 : vector<16xf32> to vector<16x1xf32>
        %70 = arith.maximumf %67, %69 : vector<16x1xf32>
        %71 = arith.subf %67, %70 : vector<16x1xf32>
        %72 = math.exp %71 : vector<16x1xf32>
        %73 = vector.broadcast %70 : vector<16x1xf32> to vector<16x16xf32>
        %74 = arith.subf %65, %73 : vector<16x16xf32>
        %75 = math.exp %74 : vector<16x16xf32>
        %c1_41 = arith.constant 1 : index
        %c0_42 = arith.constant 0 : index
        %c0_43 = arith.constant 0 : index
        %76 = vector.load %arg13[%c1_41, %c0_42, %c0_43] : memref<4x16x1xf32, #tpu.memory_space<vmem>>, vector<1x16x1xf32>
        %77 = vector.shape_cast %76 : vector<1x16x1xf32> to vector<16x1xf32>
        %78 = arith.mulf %72, %77 : vector<16x1xf32>
        %cst_44 = arith.constant dense<0.000000e+00> : vector<16xf32>
        %79 = vector.multi_reduction <add>, %75, %cst_44 [1] : vector<16x16xf32> to vector<16xf32>
        %80 = vector.shape_cast %79 : vector<16xf32> to vector<16x1xf32>
        %81 = arith.addf %78, %80 : vector<16x1xf32>
        %c1_45 = arith.constant 1 : index
        %c0_46 = arith.constant 0 : index
        %c0_47 = arith.constant 0 : index
        %82 = vector.load %arg13[%c1_45, %c0_46, %c0_47] : memref<4x16x1xf32, #tpu.memory_space<vmem>>, vector<1x16x1xf32>
        %83 = vector.shape_cast %82 : vector<1x16x1xf32> to vector<16x1xf32>
        %84 = vector.shape_cast %81 : vector<16x1xf32> to vector<1x16x1xf32>
        tpu.vector_store %arg13[%c1_45, %c0_46, %c0_47], %84 {strides = array<i32>} : memref<4x16x1xf32, #tpu.memory_space<vmem>>, vector<1x16x1xf32>,
        %c0_48 = arith.constant 0 : index
        %c8_49 = arith.constant 8 : index
        %85 = vector.load %arg11[%c0_48, %c8_49] : memref<16x32xf32, #tpu.memory_space<vmem>>, vector<16x8xf32>
        %86 = vector.broadcast %72 : vector<16x1xf32> to vector<16x8xf32>
        %87 = arith.mulf %86, %85 : vector<16x8xf32>
        %88 = arith.truncf %75 : vector<16x16xf32> to vector<16x16xbf16>
        %cst_50 = arith.constant dense<0.000000e+00> : vector<16x8xf32>
        %89 = tpu.matmul %88, %64, %cst_50 {dimension_numbers = #tpu.dot_dimension_numbers<[1], [0], [0], [1], [0, 0, 1, 1], [], []>} : vector<16x16xbf16>, vector<16x8xbf16>, vector<16x8xf32> -> vector<16x8xf32>
        %90 = arith.addf %87, %89 : vector<16x8xf32>
        %c0_51 = arith.constant 0 : index
        %c8_52 = arith.constant 8 : index
        %91 = vector.load %arg11[%c0_51, %c8_52] : memref<16x32xf32, #tpu.memory_space<vmem>>, vector<16x8xf32>
        tpu.vector_store %arg11[%c0_51, %c8_52], %90 {strides = array<i32>} : memref<16x32xf32, #tpu.memory_space<vmem>>, vector<16x8xf32>,
        %c1_53 = arith.constant 1 : index
        %c0_54 = arith.constant 0 : index
        %c0_55 = arith.constant 0 : index
        %92 = vector.load %arg12[%c1_53, %c0_54, %c0_55] : memref<4x16x1xf32, #tpu.memory_space<vmem>>, vector<1x16x1xf32>
        %93 = vector.shape_cast %92 : vector<1x16x1xf32> to vector<16x1xf32>
        %94 = vector.shape_cast %70 : vector<16x1xf32> to vector<1x16x1xf32>
        tpu.vector_store %arg12[%c1_53, %c0_54, %c0_55], %94 {strides = array<i32>} : memref<4x16x1xf32, #tpu.memory_space<vmem>>, vector<1x16x1xf32>,
        %c0_56 = arith.constant 0 : index
        %c16 = arith.constant 16 : index
        %95 = vector.load %arg10[%c0_56, %c16] : memref<16x32xbf16, #tpu.memory_space<vmem>>, vector<16x8xbf16>
        %96 = vector.extract_strided_slice %18 {offsets = [0, 16], sizes = [16, 8], strides = [1, 1]} : vector<16x32xbf16> to vector<16x8xbf16>
        %97 = vector.extract_strided_slice %20 {offsets = [0, 16], sizes = [16, 8], strides = [1, 1]} : vector<16x32xbf16> to vector<16x8xbf16>
        %cst_57 = arith.constant dense<0.000000e+00> : vector<16x16xf32>
        %98 = tpu.matmul %95, %96, %cst_57 {dimension_numbers = #tpu.dot_dimension_numbers<[1], [1], [0], [0], [0, 0, 1, 0], [], []>} : vector<16x8xbf16>, vector<16x8xbf16>, vector<16x16xf32> -> vector<16x16xf32>
        %c2 = arith.constant 2 : index
        %c0_58 = arith.constant 0 : index
        %c0_59 = arith.constant 0 : index
        %99 = vector.load %arg12[%c2, %c0_58, %c0_59] : memref<4x16x1xf32, #tpu.memory_space<vmem>>, vector<1x16x1xf32>
        %100 = vector.shape_cast %99 : vector<1x16x1xf32> to vector<16x1xf32>
        %cst_60 = arith.constant dense<0xFF800000> : vector<16xf32>
        %101 = vector.multi_reduction <maximumf>, %98, %cst_60 [1] : vector<16x16xf32> to vector<16xf32>
        %102 = vector.shape_cast %101 : vector<16xf32> to vector<16x1xf32>
        %103 = arith.maximumf %100, %102 : vector<16x1xf32>
        %104 = arith.subf %100, %103 : vector<16x1xf32>
        %105 = math.exp %104 : vector<16x1xf32>
        %106 = vector.broadcast %103 : vector<16x1xf32> to vector<16x16xf32>
        %107 = arith.subf %98, %106 : vector<16x16xf32>
        %108 = math.exp %107 : vector<16x16xf32>
        %c2_61 = arith.constant 2 : index
        %c0_62 = arith.constant 0 : index
        %c0_63 = arith.constant 0 : index
        %109 = vector.load %arg13[%c2_61, %c0_62, %c0_63] : memref<4x16x1xf32, #tpu.memory_space<vmem>>, vector<1x16x1xf32>
        %110 = vector.shape_cast %109 : vector<1x16x1xf32> to vector<16x1xf32>
        %111 = arith.mulf %105, %110 : vector<16x1xf32>
        %cst_64 = arith.constant dense<0.000000e+00> : vector<16xf32>
        %112 = vector.multi_reduction <add>, %108, %cst_64 [1] : vector<16x16xf32> to vector<16xf32>
        %113 = vector.shape_cast %112 : vector<16xf32> to vector<16x1xf32>
        %114 = arith.addf %111, %113 : vector<16x1xf32>
        %c2_65 = arith.constant 2 : index
        %c0_66 = arith.constant 0 : index
        %c0_67 = arith.constant 0 : index
        %115 = vector.load %arg13[%c2_65, %c0_66, %c0_67] : memref<4x16x1xf32, #tpu.memory_space<vmem>>, vector<1x16x1xf32>
        %116 = vector.shape_cast %115 : vector<1x16x1xf32> to vector<16x1xf32>
        %117 = vector.shape_cast %114 : vector<16x1xf32> to vector<1x16x1xf32>
        tpu.vector_store %arg13[%c2_65, %c0_66, %c0_67], %117 {strides = array<i32>} : memref<4x16x1xf32, #tpu.memory_space<vmem>>, vector<1x16x1xf32>,
        %c0_68 = arith.constant 0 : index
        %c16_69 = arith.constant 16 : index
        %118 = vector.load %arg11[%c0_68, %c16_69] : memref<16x32xf32, #tpu.memory_space<vmem>>, vector<16x8xf32>
        %119 = vector.broadcast %105 : vector<16x1xf32> to vector<16x8xf32>
        %120 = arith.mulf %119, %118 : vector<16x8xf32>
        %121 = arith.truncf %108 : vector<16x16xf32> to vector<16x16xbf16>
        %cst_70 = arith.constant dense<0.000000e+00> : vector<16x8xf32>
        %122 = tpu.matmul %121, %97, %cst_70 {dimension_numbers = #tpu.dot_dimension_numbers<[1], [0], [0], [1], [0, 0, 1, 1], [], []>} : vector<16x16xbf16>, vector<16x8xbf16>, vector<16x8xf32> -> vector<16x8xf32>
        %123 = arith.addf %120, %122 : vector<16x8xf32>
        %c0_71 = arith.constant 0 : index
        %c16_72 = arith.constant 16 : index
        %124 = vector.load %arg11[%c0_71, %c16_72] : memref<16x32xf32, #tpu.memory_space<vmem>>, vector<16x8xf32>
        tpu.vector_store %arg11[%c0_71, %c16_72], %123 {strides = array<i32>} : memref<16x32xf32, #tpu.memory_space<vmem>>, vector<16x8xf32>,
        %c2_73 = arith.constant 2 : index
        %c0_74 = arith.constant 0 : index
        %c0_75 = arith.constant 0 : index
        %125 = vector.load %arg12[%c2_73, %c0_74, %c0_75] : memref<4x16x1xf32, #tpu.memory_space<vmem>>, vector<1x16x1xf32>
        %126 = vector.shape_cast %125 : vector<1x16x1xf32> to vector<16x1xf32>
        %127 = vector.shape_cast %103 : vector<16x1xf32> to vector<1x16x1xf32>
        tpu.vector_store %arg12[%c2_73, %c0_74, %c0_75], %127 {strides = array<i32>} : memref<4x16x1xf32, #tpu.memory_space<vmem>>, vector<1x16x1xf32>,
        %c0_76 = arith.constant 0 : index
        %c24 = arith.constant 24 : index
        %128 = vector.load %arg10[%c0_76, %c24] : memref<16x32xbf16, #tpu.memory_space<vmem>>, vector<16x8xbf16>
        %129 = vector.extract_strided_slice %18 {offsets = [0, 24], sizes = [16, 8], strides = [1, 1]} : vector<16x32xbf16> to vector<16x8xbf16>
        %130 = vector.extract_strided_slice %20 {offsets = [0, 24], sizes = [16, 8], strides = [1, 1]} : vector<16x32xbf16> to vector<16x8xbf16>
        %cst_77 = arith.constant dense<0.000000e+00> : vector<16x16xf32>
        %131 = tpu.matmul %128, %129, %cst_77 {dimension_numbers = #tpu.dot_dimension_numbers<[1], [1], [0], [0], [0, 0, 1, 0], [], []>} : vector<16x8xbf16>, vector<16x8xbf16>, vector<16x16xf32> -> vector<16x16xf32>
        %c3 = arith.constant 3 : index
        %c0_78 = arith.constant 0 : index
        %c0_79 = arith.constant 0 : index
        %132 = vector.load %arg12[%c3, %c0_78, %c0_79] : memref<4x16x1xf32, #tpu.memory_space<vmem>>, vector<1x16x1xf32>
        %133 = vector.shape_cast %132 : vector<1x16x1xf32> to vector<16x1xf32>
        %cst_80 = arith.constant dense<0xFF800000> : vector<16xf32>
        %134 = vector.multi_reduction <maximumf>, %131, %cst_80 [1] : vector<16x16xf32> to vector<16xf32>
        %135 = vector.shape_cast %134 : vector<16xf32> to vector<16x1xf32>
        %136 = arith.maximumf %133, %135 : vector<16x1xf32>
        %137 = arith.subf %133, %136 : vector<16x1xf32>
        %138 = math.exp %137 : vector<16x1xf32>
        %139 = vector.broadcast %136 : vector<16x1xf32> to vector<16x16xf32>
        %140 = arith.subf %131, %139 : vector<16x16xf32>
        %141 = math.exp %140 : vector<16x16xf32>
        %c3_81 = arith.constant 3 : index
        %c0_82 = arith.constant 0 : index
        %c0_83 = arith.constant 0 : index
        %142 = vector.load %arg13[%c3_81, %c0_82, %c0_83] : memref<4x16x1xf32, #tpu.memory_space<vmem>>, vector<1x16x1xf32>
        %143 = vector.shape_cast %142 : vector<1x16x1xf32> to vector<16x1xf32>
        %144 = arith.mulf %138, %143 : vector<16x1xf32>
        %cst_84 = arith.constant dense<0.000000e+00> : vector<16xf32>
        %145 = vector.multi_reduction <add>, %141, %cst_84 [1] : vector<16x16xf32> to vector<16xf32>
        %146 = vector.shape_cast %145 : vector<16xf32> to vector<16x1xf32>
        %147 = arith.addf %144, %146 : vector<16x1xf32>
        %c3_85 = arith.constant 3 : index
        %c0_86 = arith.constant 0 : index
        %c0_87 = arith.constant 0 : index
        %148 = vector.load %arg13[%c3_85, %c0_86, %c0_87] : memref<4x16x1xf32, #tpu.memory_space<vmem>>, vector<1x16x1xf32>
        %149 = vector.shape_cast %148 : vector<1x16x1xf32> to vector<16x1xf32>
        %150 = vector.shape_cast %147 : vector<16x1xf32> to vector<1x16x1xf32>
        tpu.vector_store %arg13[%c3_85, %c0_86, %c0_87], %150 {strides = array<i32>} : memref<4x16x1xf32, #tpu.memory_space<vmem>>, vector<1x16x1xf32>,
        %c0_88 = arith.constant 0 : index
        %c24_89 = arith.constant 24 : index
        %151 = vector.load %arg11[%c0_88, %c24_89] : memref<16x32xf32, #tpu.memory_space<vmem>>, vector<16x8xf32>
        %152 = vector.broadcast %138 : vector<16x1xf32> to vector<16x8xf32>
        %153 = arith.mulf %152, %151 : vector<16x8xf32>
        %154 = arith.truncf %141 : vector<16x16xf32> to vector<16x16xbf16>
        %cst_90 = arith.constant dense<0.000000e+00> : vector<16x8xf32>
        %155 = tpu.matmul %154, %130, %cst_90 {dimension_numbers = #tpu.dot_dimension_numbers<[1], [0], [0], [1], [0, 0, 1, 1], [], []>} : vector<16x16xbf16>, vector<16x8xbf16>, vector<16x8xf32> -> vector<16x8xf32>
        %156 = arith.addf %153, %155 : vector<16x8xf32>
        %c0_91 = arith.constant 0 : index
        %c24_92 = arith.constant 24 : index
        %157 = vector.load %arg11[%c0_91, %c24_92] : memref<16x32xf32, #tpu.memory_space<vmem>>, vector<16x8xf32>
        tpu.vector_store %arg11[%c0_91, %c24_92], %156 {strides = array<i32>} : memref<16x32xf32, #tpu.memory_space<vmem>>, vector<16x8xf32>,
        %c3_93 = arith.constant 3 : index
        %c0_94 = arith.constant 0 : index
        %c0_95 = arith.constant 0 : index
        %158 = vector.load %arg12[%c3_93, %c0_94, %c0_95] : memref<4x16x1xf32, #tpu.memory_space<vmem>>, vector<1x16x1xf32>
        %159 = vector.shape_cast %158 : vector<1x16x1xf32> to vector<16x1xf32>
        %160 = vector.shape_cast %136 : vector<16x1xf32> to vector<1x16x1xf32>
        tpu.vector_store %arg12[%c3_93, %c0_94, %c0_95], %160 {strides = array<i32>} : memref<4x16x1xf32, #tpu.memory_space<vmem>>, vector<1x16x1xf32>,
      } else {
      }
    } else {
    }
    %c1_i32_4 = arith.constant 1 : i32
    %10 = arith.cmpi eq, %arg2, %c1_i32_4 : i32
    %11 = arith.extui %10 : i1 to i32
    %c0_i32_5 = arith.constant 0 : i32
    %12 = arith.cmpi ne, %11, %c0_i32_5 : i32
    scf.if %12 {
      %c0 = arith.constant 0 : index
      %c0_6 = arith.constant 0 : index
      %c0_7 = arith.constant 0 : index
      %13 = vector.load %arg13[%c0, %c0_6, %c0_7] : memref<4x16x1xf32, #tpu.memory_space<vmem>>, vector<1x16x1xf32>
      %14 = vector.shape_cast %13 : vector<1x16x1xf32> to vector<16x1xf32>
      %15 = tpu.reciprocal %14 {approx = true} : vector<16x1xf32> -> vector<16x1xf32>
      %c0_8 = arith.constant 0 : index
      %c0_9 = arith.constant 0 : index
      %16 = vector.load %arg11[%c0_8, %c0_9] : memref<16x32xf32, #tpu.memory_space<vmem>>, vector<16x8xf32>
      %17 = vector.broadcast %15 : vector<16x1xf32> to vector<16x8xf32>
      %18 = arith.mulf %16, %17 : vector<16x8xf32>
      %c0_10 = arith.constant 0 : index
      %c0_11 = arith.constant 0 : index
      %19 = vector.load %arg11[%c0_10, %c0_11] : memref<16x32xf32, #tpu.memory_space<vmem>>, vector<16x8xf32>
      tpu.vector_store %arg11[%c0_10, %c0_11], %18 {strides = array<i32>} : memref<16x32xf32, #tpu.memory_space<vmem>>, vector<16x8xf32>,
      %c1 = arith.constant 1 : index
      %c0_12 = arith.constant 0 : index
      %c0_13 = arith.constant 0 : index
      %20 = vector.load %arg13[%c1, %c0_12, %c0_13] : memref<4x16x1xf32, #tpu.memory_space<vmem>>, vector<1x16x1xf32>
      %21 = vector.shape_cast %20 : vector<1x16x1xf32> to vector<16x1xf32>
      %22 = tpu.reciprocal %21 {approx = true} : vector<16x1xf32> -> vector<16x1xf32>
      %c0_14 = arith.constant 0 : index
      %c8 = arith.constant 8 : index
      %23 = vector.load %arg11[%c0_14, %c8] : memref<16x32xf32, #tpu.memory_space<vmem>>, vector<16x8xf32>
      %24 = vector.broadcast %22 : vector<16x1xf32> to vector<16x8xf32>
      %25 = arith.mulf %23, %24 : vector<16x8xf32>
      %c0_15 = arith.constant 0 : index
      %c8_16 = arith.constant 8 : index
      %26 = vector.load %arg11[%c0_15, %c8_16] : memref<16x32xf32, #tpu.memory_space<vmem>>, vector<16x8xf32>
      tpu.vector_store %arg11[%c0_15, %c8_16], %25 {strides = array<i32>} : memref<16x32xf32, #tpu.memory_space<vmem>>, vector<16x8xf32>,
      %c2 = arith.constant 2 : index
      %c0_17 = arith.constant 0 : index
      %c0_18 = arith.constant 0 : index
      %27 = vector.load %arg13[%c2, %c0_17, %c0_18] : memref<4x16x1xf32, #tpu.memory_space<vmem>>, vector<1x16x1xf32>
      %28 = vector.shape_cast %27 : vector<1x16x1xf32> to vector<16x1xf32>
      %29 = tpu.reciprocal %28 {approx = true} : vector<16x1xf32> -> vector<16x1xf32>
      %c0_19 = arith.constant 0 : index
      %c16 = arith.constant 16 : index
      %30 = vector.load %arg11[%c0_19, %c16] : memref<16x32xf32, #tpu.memory_space<vmem>>, vector<16x8xf32>
      %31 = vector.broadcast %29 : vector<16x1xf32> to vector<16x8xf32>
      %32 = arith.mulf %30, %31 : vector<16x8xf32>
      %c0_20 = arith.constant 0 : index
      %c16_21 = arith.constant 16 : index
      %33 = vector.load %arg11[%c0_20, %c16_21] : memref<16x32xf32, #tpu.memory_space<vmem>>, vector<16x8xf32>
      tpu.vector_store %arg11[%c0_20, %c16_21], %32 {strides = array<i32>} : memref<16x32xf32, #tpu.memory_space<vmem>>, vector<16x8xf32>,
      %c3 = arith.constant 3 : index
      %c0_22 = arith.constant 0 : index
      %c0_23 = arith.constant 0 : index
      %34 = vector.load %arg13[%c3, %c0_22, %c0_23] : memref<4x16x1xf32, #tpu.memory_space<vmem>>, vector<1x16x1xf32>
      %35 = vector.shape_cast %34 : vector<1x16x1xf32> to vector<16x1xf32>
      %36 = tpu.reciprocal %35 {approx = true} : vector<16x1xf32> -> vector<16x1xf32>
      %c0_24 = arith.constant 0 : index
      %c24 = arith.constant 24 : index
      %37 = vector.load %arg11[%c0_24, %c24] : memref<16x32xf32, #tpu.memory_space<vmem>>, vector<16x8xf32>
      %38 = vector.broadcast %36 : vector<16x1xf32> to vector<16x8xf32>
      %39 = arith.mulf %37, %38 : vector<16x8xf32>
      %c0_25 = arith.constant 0 : index
      %c24_26 = arith.constant 24 : index
      %40 = vector.load %arg11[%c0_25, %c24_26] : memref<16x32xf32, #tpu.memory_space<vmem>>, vector<16x8xf32>
      tpu.vector_store %arg11[%c0_25, %c24_26], %39 {strides = array<i32>} : memref<16x32xf32, #tpu.memory_space<vmem>>, vector<16x8xf32>,
      %c0_27 = arith.constant 0 : index
      %c0_28 = arith.constant 0 : index
      %41 = vector.load %arg11[%c0_27, %c0_28] : memref<16x32xf32, #tpu.memory_space<vmem>>, vector<16x32xf32>
      %42 = arith.truncf %41 : vector<16x32xf32> to vector<16x32xbf16>
      %c0_29 = arith.constant 0 : index
      %c0_30 = arith.constant 0 : index
      %43 = vector.load %arg7[%c0_29, %c0_30] : memref<32x32xbf16, #tpu.memory_space<vmem>>, vector<32x32xbf16>
      %cst = arith.constant dense<0.000000e+00> : vector<16x32xf32>
      %44 = tpu.matmul %42, %43, %cst {dimension_numbers = #tpu.dot_dimension_numbers<[1], [0], [0], [1], [0, 0, 1, 1], [], []>} : vector<16x32xbf16>, vector<32x32xbf16>, vector<16x32xf32> -> vector<16x32xf32>
      %c0_31 = arith.constant 0 : index
      %c0_32 = arith.constant 0 : index
      %45 = vector.load %arg8[%c0_31, %c0_32] : memref<1x32xf32, #tpu.memory_space<vmem>>, vector<1x32xf32>
      %46 = vector.broadcast %45 : vector<1x32xf32> to vector<16x32xf32>
      %47 = arith.addf %44, %46 : vector<16x32xf32>
      %48 = vector.shape_cast %47 : vector<16x32xf32> to vector<1x16x32xf32>
      %49 = arith.truncf %48 : vector<1x16x32xf32> to vector<1x16x32xbf16>
      %c0_33 = arith.constant 0 : index
      %c0_34 = arith.constant 0 : index
      %c0_35 = arith.constant 0 : index
      %50 = vector.load %arg9[%c0_33, %c0_34, %c0_35] : memref<1x16x32xbf16, #tpu.memory_space<vmem>>, vector<1x16x32xbf16>
      tpu.vector_store %arg9[%c0_33, %c0_34, %c0_35], %49 {strides = array<i32>} : memref<1x16x32xbf16, #tpu.memory_space<vmem>>, vector<1x16x32xbf16>,
    } else {
    }
    return
  }
  func.func @transform_0(%arg0: i32, %arg1: i32, %arg2: i32) -> (i32, i32, i32) {
    %c0_i32 = arith.constant 0 : i32
    %c0_i32_0 = arith.constant 0 : i32
    return %arg0, %arg1, %c0_i32 : i32, i32, i32
  }
  func.func @transform_1(%arg0: i32, %arg1: i32, %arg2: i32) -> (i32, i32, i32) {
    %c0_i32 = arith.constant 0 : i32
    %c0_i32_0 = arith.constant 0 : i32
    return %arg0, %arg2, %c0_i32 : i32, i32, i32
  }
  func.func @transform_2(%arg0: i32, %arg1: i32, %arg2: i32) -> (i32, i32) {
    %c0_i32 = arith.constant 0 : i32
    %c0_i32_0 = arith.constant 0 : i32
    %c0_i32_1 = arith.constant 0 : i32
    return %c0_i32, %c0_i32_0 : i32, i32
  }
  func.func @transform_3(%arg0: i32, %arg1: i32, %arg2: i32) -> (i32, i32) {
    %c0_i32 = arith.constant 0 : i32
    %c0_i32_0 = arith.constant 0 : i32
    %c0_i32_1 = arith.constant 0 : i32
    return %c0_i32, %c0_i32_0 : i32, i32
  }
  func.func @transform_4(%arg0: i32, %arg1: i32, %arg2: i32) -> (i32, i32) {
    %c0_i32 = arith.constant 0 : i32
    %c0_i32_0 = arith.constant 0 : i32
    %c0_i32_1 = arith.constant 0 : i32
    return %c0_i32, %c0_i32_0 : i32, i32
  }
  func.func @transform_5(%arg0: i32, %arg1: i32, %arg2: i32) -> (i32, i32) {
    %c0_i32 = arith.constant 0 : i32
    %c0_i32_0 = arith.constant 0 : i32
    %c0_i32_1 = arith.constant 0 : i32
    return %c0_i32, %c0_i32_0 : i32, i32
  }
  func.func @transform_6(%arg0: i32, %arg1: i32, %arg2: i32) -> (i32, i32, i32) {
    %c0_i32 = arith.constant 0 : i32
    %c0_i32_0 = arith.constant 0 : i32
    return %arg0, %arg1, %c0_i32 : i32, i32, i32
  }
}

</mosaic_0001>

<bundles_post_ra>
// kernel: tpu_custom_call.1
= control target key start
LH: loop header
LB: loop body
LE: loop exit
PB: predicated region body
PF: predicated region fallthrough
CT: control target
= control target key end

     0   :  { %s4097_s0 = inlined_call_operand.hbm [shape: bf16[2,32,32], index: 0, kind: input, shape index: {}]   ;;  %s4098_s1 = inlined_call_operand.hbm [shape: bf16[2,32,32], index: 1, kind: input, shape index: {}]   ;;  %s4099_s2 = inlined_call_operand.hbm [shape: bf16[32,32], index: 2, kind: input, shape index: {}]   ;;  %s4100_s3 = inlined_call_operand.hbm [shape: bf16[32,64], index: 3, kind: input, shape index: {}]   ;;  %s4101_s4 = inlined_call_operand.hbm [shape: bf16[32,32], index: 4, kind: input, shape index: {}]   ;;  %s4102_s5 = inlined_call_operand.vmem [shape: f32[1,32], index: 5, kind: input, shape index: {}]   ;;  %s4103_s6 = inlined_call_operand.hbm [shape: bf16[2,32,32], index: 6, kind: output, shape index: {}]  }
   0x1   :  { %4125 = sst [smem:[#allocation32_spill]] %s4099_s2 }
   0x2   :  { %4126 = sst [smem:[#allocation33_spill]] %s4100_s3 }
   0x3   :  { %4127 = sst [smem:[#allocation34_spill]] %s4101_s4 }
   0x4   :  { %4128 = sst [smem:[#allocation35_spill]] %s4102_s5 }
   0x5   :  { %4129 = sst [smem:[#allocation36_spill]] %s4103_s6 }
   0x6   :  { %11 = vsyncpa [#allocation7], 0 }
   0x7   :  { %13 = vsyncpa [#allocation7 + $0x1], 0 }
   0x8   :  { %14 = vsyncpa [#allocation10], 0 }
   0x9   :  { %16 = vsyncpa [#allocation10 + $0x1], 0 }
   0xa   :  { %17 = vsyncpa [#allocation13], 0 }
   0xb   :  { %18 = vsyncpa [#allocation8], 0 }
   0xc   :  { %20 = vsyncpa [#allocation8 + $0x1], 0  ;;  %s3273_s21 = smov 0   ;;  %s3275_s22 = smov 0  }
   0xd   :  { %s3277_s23 = smov 0   ;;  %s3279_s24 = smov 0  }
   0xe   :  { %s3281_s25 = smov 0   ;;  %s3283_s26 = smov 0  }
   0xf   :  { %s3285_s27 = smov 0   ;;  %s3287_s28 = smov 0  }
  0x10   :  { %s3289_s29 = smov 0   ;;  %s3291_s30 = smov 0  }
  0x11   :  { %s3293_s7 = smov 0   ;;  %s3295_s8 = smov 0  }
  0x12   :  { %s3297_s9 = smov 0  }
  0x13 LB: > { %4130 = sst [smem:[#allocation21_spill]] %s3156_s24  ;;  %s3337_s10 = sadd.s32 4294967295, %s3192_s9   ;;  %s3192_s9 = sphi %s3297_s9, %s26_s9   ;;  %s3188_s8 = sphi %s3295_s8, %s4192_s8   ;;  %s3184_s7 = sphi %s3293_s7, %s4191_s7   ;;  %s3180_s30 = sphi %s3291_s30, %s4190_s30   ;;  %s3176_s29 = sphi %s3289_s29, %s4189_s29   ;;  %s3172_s28 = sphi %s3287_s28, %s4188_s28   ;;  %s3168_s27 = sphi %s3285_s27, %s4187_s27   ;;  %s3164_s26 = sphi %s3283_s26, %s4186_s26   ;;  %s3160_s25 = sphi %s3281_s25, %s4185_s25   ;;  %s3156_s24 = sphi %s3279_s24, %s4184_s24   ;;  %s3152_s23 = sphi %s3277_s23, %s4183_s23   ;;  %s3148_s22 = sphi %s3275_s22, %s4182_s22   ;;  %s3144_s21 = sphi %s3273_s21, %s4181_s21  }
  0x14   : > { %4131 = sst [smem:[#allocation22_spill]] %s3168_s27  ;;  %s2377_s11 = sadd.s32 4294967294, %s3192_s9  }
  0x15   : > { %4132 = sst [smem:[#allocation23_spill]] %s3172_s28  ;;  %p67_p0 = scmp.ne.s32.totalorder %s3160_s25, %s3156_s24 }
  0x16   : > { %4133 = sst [smem:[#allocation24_spill]] %s3176_s29  ;;  %p4105_p1 = scmp.eq.s32.totalorder %s3337_s10, 0 }
  0x17   : > { %4134 = sst [smem:[#allocation25_spill]] %s3337_s10  ;;  %p95_p2 = scmp.ne.s32.totalorder %s3148_s22, %s3144_s21 }
  0x18   : > { %p3347_p4 = por %p4105_p1, %p67_p0  ;;  %p211_p5 = scmp.eq.s32.totalorder %s2377_s11, 7 }
  0x19   : > { %p3353_p6 = por %p95_p2, %p4105_p1  ;;  %p2378_p7 = scmp.ge.s32.totalorder %s3192_s9, 1 }
  0x1a   : > { %s4135_s12 = scalar_select %p3347_p4, 1, 0 }
  0x1b   : > { %s4137_s13 = scalar_select %p3353_p6, 1, 0 }
  0x1c   : > { %4136 = sst [smem:[#allocation26_spill]] %s4135_s12  ;;  %p3358_p8 = por %p211_p5, %p67_p0 }
  0x1d   : > { %4138 = sst [smem:[#allocation27_spill]] %s4137_s13  ;;  %p218_p9 = scmp.lt.s32.totalorder %s3192_s9, 9 }
  0x1e   : > { %s4139_s14 = scalar_select %p3358_p8, 1, 0 }
  0x1f   : > { %p3363_p10 = pnand %p2378_p7, %p218_p9  ;;  %s3194_s16 = smov [#allocation11]  }
  0x20   : > { %4140 = sst [smem:[#allocation28_spill]] %s4139_s14  ;;  %s230_s17 = sshll.u32 %s3194_s16, 4  ;;  %s231_s17 = int_to_ptr.vmem [resolvable:$true] %s230_s17 }
  0x21   : > { %p2634_p11 = pneg %p3363_p10  ;;  %s3195_s19 = smov [#allocation12]  }
  0x22   : > { %s243_s20 = sshll.u32 %s3195_s19, 4  ;;  %s3196_s21 = smov [#allocation14]   ;;  %s244_s20 = int_to_ptr.vmem [resolvable:$true] %s243_s20 }
  0x23   : > { %p3371_p12 = pnand %p2634_p11, %p4105_p1  ;;  %s256_s11 = sshll.u32 %s3196_s21, 4  ;;  %s257_s11 = int_to_ptr.vmem [resolvable:$true] %s256_s11 }
  0x24   : > { %s2921_s14 = scalar_lea.vmem %s231_s17, 256  ;;  %p2929_p7 = scmp.lt.s32.totalorder %s231_s17, %s231_s17 }
  0x25   : > { %p2912_p13 = pneg %p3371_p12  ;;  %p2922_p0 = scmp.ne.s32.totalorder %s231_s17, %s2921_s14 }
  0x26   : > { %p2930_p9 = scmp.lt.s32.totalorder %s2921_s14, %s2921_s14 }
  0x27   : > { %p2924_p2 = pnand %p2922_p0, %p2912_p13 }
  0x28   : > { %p2931_p11 = por %p2930_p9, %p2929_p7 }
  0x29   : > { %p2925_p5 = pneg %p2924_p2 }
  0x2b   : > { %p2932_p1 = pnand %p2931_p11, %p2925_p5 }
  0x2d   : > { %2935 = shalt.err (!%p2932_p1)
}
  0x2e   : > { %s4108_s16 = smov 64   ;;  %s4110_s19 = smov 4  }
  0x2f   : > { %s4143_s2 = sld [smem:[#allocation32_spill]]  ;;  %s2947_s6 = scalar_lea.vmem %s244_s20, 256 }
  0x30   : > { %p2948_p0 = scmp.ne.s32.totalorder %s244_s20, %s2947_s6  ;;  %p2955_p5 = scmp.lt.s32.totalorder %s244_s20, %s244_s20 }
  0x31   : > { %p2956_p1 = scmp.lt.s32.totalorder %s2947_s6, %s2947_s6 }
  0x32   : > { %p2950_p2 = pnand %p2948_p0, %p2912_p13 }
  0x33   : > { %p2957_p9 = por %p2956_p1, %p2955_p5 }
  0x34   : > { %p2951_p7 = pneg %p2950_p2 }
  0x35   : > { %2637 = dma.hbm_to_vmem [thread:$0]  (!%p3371_p12), %s4143_s2, 256, %s231_s17, [#allocation10], %s4108_s16, %s4108_s16, %s4110_s19  }
  0x36   : > { %p2958_p11 = pnand %p2957_p9, %p2951_p7 }
  0x38   : > { %2961 = shalt.err (!%p2958_p11)
}
  0x39   : > { %s4144_s3 = sld [smem:[#allocation33_spill]]  ;;  %s2973_s24 = scalar_lea.vmem %s257_s11, 256 }
  0x3a   : > { %p2974_p3 = scmp.ne.s32.totalorder %s257_s11, %s2973_s24  ;;  %p2981_p5 = scmp.lt.s32.totalorder %s257_s11, %s257_s11 }
  0x3b   : > { %p2982_p7 = scmp.lt.s32.totalorder %s2973_s24, %s2973_s24 }
  0x3c   : > { %p2976_p0 = pnand %p2974_p3, %p2912_p13 }
  0x3d   : > { %p2983_p1 = por %p2982_p7, %p2981_p5 }
  0x3e   : > { %p2977_p2 = pneg %p2976_p0 }
  0x3f   : > { %2640 = dma.hbm_to_vmem [thread:$0]  (!%p3371_p12), %s4144_s3, 256, %s244_s20, [#allocation13], %s4108_s16, %s4108_s16, %s4110_s19  }
  0x40   : > { %p2984_p9 = pnand %p2983_p1, %p2977_p2 }
  0x42   : > { %2987 = shalt.err (!%p2984_p9)
}
  0x43   : > { %s4145_s4 = sld [smem:[#allocation34_spill]]  ;;  %s38_s17 = sadd.s32 1, %s3180_s30 }
  0x44   : > { %p39_p3 = scmp.ge.s32.totalorder %s38_s17, 2  ;;  %s41_s18 = sadd.s32 1, %s3184_s7 }
  0x45   : > { %s45_s20 = sadd.s32 1, %s3188_s8  ;;  %s54_s21 = sadd.s32 1, %s3164_s26 }
  0x46   : > { %s4194_s17 = smov (%p39_p3, %s38_s17), 0  ;;  %s4196_s18 = smov (!%p39_p3, %s41_s18), %s3184_s7 }
  0x47   : > { %4146 = sst [smem:[#allocation29_spill]] %s4194_s17  ;;  %p61_p13 = scmp.ne.s32.totalorder %s3164_s26, %s3160_s25 }
  0x48   : > { %p4123_p11 = scmp.eq.s32.totalorder %s3192_s9, 0  ;;  %p43_p0 = scmp.ge.s32.totalorder %s4196_s18, 2 }
  0x49   : > { %2643 = dma.hbm_to_vmem [thread:$0]  (!%p3371_p12), %s4145_s4, 256, %s257_s11, [#allocation13], %s4108_s16, %s4108_s16, %s4110_s19  }
  0x4a   : > { %s78_s14 = ssub.s32 %s3180_s30, %s4194_s17  ;;  %p3424_p12 = por %p4123_p11, %p61_p13 }
  0x4b   : > { %p4148_p2 = scmp.eq.s32.totalorder %s3337_s10, 7  ;;  %s4198_s18 = smov (%p43_p0, %s4196_s18), 0 }
  0x4c   : > { %4151 = sst [smem:[#allocation31_spill]] %s4198_s18  ;;  %s4200_s20 = smov (!%p43_p0, %s45_s20), %s3188_s8 }
  0x4d   : > { %p3430_p5 = por %p4148_p2, %p61_p13  ;;  %s50_s6 = ssub.s32 %s3184_s7, %s4198_s18 }
  0x4e   : > { %p4124_p7 = scmp.lt.s32.totalorder %s3192_s9, 8  ;;  %p47_p1 = scmp.ge.s32.totalorder %s4200_s20, 2 }
  0x4f   : > { %s4149_s24 = scalar_select %p3430_p5, 1, 0 }
  0x50   : > { %s273_s29 = sand.u32 1, %s3164_s26   ;;  %s4202_s20 = smov (%p47_p1, %s4200_s20), 0 }
  0x51   : > { %4150 = sst [smem:[#allocation30_spill]] %s4149_s24  ;;  %s2383_s16 = sshll.u32 %s273_s29, 3 }
  0x52   : > { %s2384_s19 = sshll.u32 %s3184_s7, 1  ;;  %s49_s2 = ssub.s32 %s3188_s8, %s4202_s20 }
  0x53   : > { %s2385_s3 = sshll.u32 %s3188_s8, 2  ;;  %s51_s4 = sor.u32 %s50_s6, %s49_s2 }
  0x54   : > { %s3447_s17 = sor.u32 %s78_s14, %s49_s2  ;;  %p52_p9 = scmp.eq.s32.totalorder %s51_s4, 0 }
  0x55   : > { %s283_s18 = sadd.s32 %s2385_s3, %s2384_s19  ;;  %s277_s24 = scalar_lea.vmem [#allocation6], %s2383_s16 }
  0x56   : > { %s286_s5 = sshll.u32 %s277_s24, 4  ;;  %s2386_s28 = sshll.u32 %s283_s18, 6  ;;  %s287_s5 = int_to_ptr.vmem [resolvable:$true] %s286_s5 }
  0x57   : > { %s3451_s27 = scalar_select %p52_p9, %s3164_s26, %s54_s21  }
  0x58   : > { %s285_s12 = scalar_lea.hbm %s4097_s0, %s2386_s28  ;;  %p3460_p13 = pnand %p4124_p7, %p3424_p12 }
  0x59   : > { %s2388_s2 = sshll.u32 %s3180_s30, 1  ;;  %s274_s19 = scalar_lea.sflag [#allocation7], %s273_s29 }
  0x5a   : > { %s306_s4 = sadd.s32 %s2388_s2, %s2385_s3  ;;  %p2990_p0 = pneg %p3460_p13 }
  0x5b   : > { %s3001_s16 = scalar_lea.vmem %s287_s5, 128  ;;  %s3199_s18 = smov [#allocation6]  }
  0x5c   : > { %p3002_p2 = scmp.ne.s32.totalorder %s287_s5, %s3001_s16  ;;  %s3006_s21 = sshll.u32 %s3199_s18, 4  ;;  %s3007_s21 = int_to_ptr.vmem [resolvable:$false] %s3006_s21 }
  0x5d   : > { %s3008_s28 = scalar_lea.vmem %s3007_s21, 256  ;;  %p3009_p11 = scmp.lt.s32.totalorder %s287_s5, %s3007_s21 }
  0x5e   : > { %p3004_p1 = pnand %p3002_p2, %p2990_p0  ;;  %p3010_p3 = scmp.lt.s32.totalorder %s3008_s28, %s3001_s16 }
  0x60   : > { %p3005_p9 = pneg %p3004_p1  ;;  %p3011_p12 = por %p3010_p3, %p3009_p11 }
  0x62   : > { %p3012_p7 = pnand %p3011_p12, %p3005_p9 }
  0x64   : > { %3015 = shalt.err (!%p3012_p7)
}
  0x65   : > { %s4153_s10 = smov 4   ;;  %s4154_s3 = smov 64  }
  0x66   : > { %2647 = dma.hbm_to_vmem [thread:$0]  (!%p3460_p13), %s285_s12, 128, %s287_s5, %s274_s19, %s4154_s3, %s4154_s3, %s4153_s10  }
  0x67   : > { %s2390_s13 = sshll.u32 %s306_s4, 6  ;;  %s82_s14 = sadd.s32 1, %s3152_s23 }
  0x68   : > { %p4155_p11 = scmp.eq.s32.totalorder %s3447_s17, 0  ;;  %p89_p7 = scmp.ne.s32.totalorder %s3152_s23, %s3148_s22 }
  0x69   : > { %s296_s24 = sand.u32 1, %s3192_s9   ;;  %s308_s2 = scalar_lea.hbm %s4098_s1, %s2390_s13 }
  0x6a   : > { %s3476_s11 = scalar_select %p4155_p11, %s3152_s23, %s82_s14  }
  0x6b   : > { %s298_s16 = sand.u32 1, %s3152_s23   ;;  %p4156_p3 = scmp.eq.s32.totalorder %s3192_s9, 0 }
  0x6c   : > { %s2387_s18 = sshll.u32 %s298_s16, 3  ;;  %p4157_p2 = scmp.lt.s32.totalorder %s3192_s9, 8 }
  0x6d   : > { %p91_p0 = por %p89_p7, %p4156_p3  ;;  %s300_s21 = scalar_lea.vmem [#allocation9], %s2387_s18 }
  0x6e   : > { %s309_s28 = sshll.u32 %s300_s21, 4  ;;  %s297_s12 = scalar_lea.sflag [#allocation10], %s296_s24  ;;  %s310_s28 = int_to_ptr.vmem [resolvable:$true] %s309_s28 }
  0x6f   : > { %p3489_p1 = pnand %p4157_p2, %p91_p0  ;;  %s3029_s17 = scalar_lea.vmem %s310_s28, 128 }
  0x70   : > { %p3030_p9 = scmp.ne.s32.totalorder %s310_s28, %s3029_s17  ;;  %s3200_s4 = smov [#allocation9]  }
  0x71   : > { %p3018_p13 = pneg %p3489_p1  ;;  %s3034_s19 = sshll.u32 %s3200_s4, 4  ;;  %s3035_s19 = int_to_ptr.vmem [resolvable:$false] %s3034_s19 }
  0x72   : > { %s3036_s13 = scalar_lea.vmem %s3035_s19, 256  ;;  %p3037_p7 = scmp.lt.s32.totalorder %s310_s28, %s3035_s19 }
  0x73   : > { %p3032_p12 = pnand %p3030_p9, %p3018_p13  ;;  %p3038_p3 = scmp.lt.s32.totalorder %s3036_s13, %s3029_s17 }
  0x75   : > { %p3033_p11 = pneg %p3032_p12  ;;  %p3039_p8 = por %p3038_p3, %p3037_p7 }
  0x77   : > { %p3040_p0 = pnand %p3039_p8, %p3033_p11 }
  0x79   : > { %3043 = shalt.err (!%p3040_p0)
}
  0x7a   : > { %2650 = dma.hbm_to_vmem [thread:$0]  (!%p3489_p1), %s308_s2, 128, %s310_s28, %s297_s12, %s4154_s3, %s4154_s3, %s4153_s10  }
  0x7b   : > { %321 = sbr.rel (%p3363_p10) target bundleno = 3765 (0xeb5), region = 44  ;;  %s3503_s24 = sand.u32 (!%p3363_p10), 1, %s3160_s25  }
  0x7c   : > { %s2392_s29 = sshll.u32 (!%p3363_p10), %s3503_s24, 3  ;;  %s324_s6 = scalar_lea.sflag (!%p3363_p10), [#allocation7], %s3503_s24 }
  0x7d   : > { %s3507_s16 = scalar_lea.vmem (!%p3363_p10), [#allocation6], %s2392_s29 }
  0x80   : > { %3123 = dma.done.wait (%p3347_p4), %s324_s6, 128  }
  0x81   : > { %3125 = vsyncadd (%p3347_p4), %s324_s6, 4294967168  ;;  %s4160_s18 = sld [smem:[#allocation25_spill]]  ;;  %s334_s3 = sand.u32 1, %s3148_s22  }
  0x82   : > { %s3515_s2 = sshll.u32 %s334_s3, 3 }
  0x83   : > { %s336_s28 = scalar_lea.vmem [#allocation9], %s3515_s2 }
  0x87   : > { %s332_s15 = sand.u32 1, %s4160_s18  }
  0x88   : > { %s333_s21 = scalar_lea.sflag [#allocation10], %s332_s15 }
  0x89   : > { %3127 = dma.done.wait (%p3353_p6), %s333_s21, 128  }
  0x8a   : > { %3129 = vsyncadd (%p3353_p6), %s333_s21, 4294967168  ;;  %p4162_p8 = scmp.eq.s32.totalorder %s4160_s18, 0 }
  0x8c   : > { %3131 = dma.done.wait (%p4162_p8), [#allocation10], 256   ;;  %p4163_p4 = pmov %p4162_p8 }
  0x8e   : > { %3133 = vsyncadd (%p4163_p4), [#allocation10], 4294967040  ;;  %p4164_p10 = pmov %p4163_p4 }
  0x8f   : > { %p4165_p2 = pmov %p4163_p4 }
  0x90   : > { %3135 = dma.done.wait (%p4164_p10), [#allocation13], 512  }
  0x91   : > { %3137 = vsyncadd (%p4165_p2), [#allocation13], 4294966784  ;;  %s4166_s5 = sld [smem:[#allocation23_spill]]  ;;  %s3536_s19 = scalar_lea.vmem [#allocation15], %s2392_s29 }
  0x92   : > { %s4167_s12 = sld [smem:[#allocation22_spill]] }
  0x97   : > { %s3531_s17 = sshll.u32 %s4166_s5, 4 }
  0x98   : > { %s3534_s4 = sshll.u32 %s4167_s12, 4  ;;  %p2400_p6 = scmp.ne.s32.totalorder %s4167_s12, 0 }
  0x9a   : > { %391 = sbr.rel (%p2400_p6) target bundleno = 370 (0x172), region = 68 }
  0x9f   : > { %vm473_vm0 = vcmask 7168   ;;  %v3201_v0 = vmov 0.0   ;;  %v3202_v1 = vmov -1e+30   ;;  %v2808_v2 = vld [vmem:[#allocation11 + $0x8] sm:$0xff]   ;;  %vm3203_vm1 = vmmov 0  }
  0xa0   : > { %2496 = vmatprep.subr.bf16.mxu0 %v3201_v0  ;;  %474 = vst.msk [vmem:[#allocation4] sm:$0xff] %vm473_vm0, %v3202_v1  ;;  %475 = vst.msk [vmem:[#allocation4 + $0x8] sm:$0xff] %vm473_vm0, %v3202_v1  ;;  %2500 = vmatprep.mubr.msk.bf16.mxu0 %vm3203_vm1, %v3201_v0  ;;  %vm415_vm2 = vcmask 261120   ;;  %v2809_v3 = vld [vmem:[#allocation11] sm:$0xff]   ;;  %vm470_vm3 = vcmask 257024  }
  0xa1   : > { %476 = vst.msk [vmem:[#allocation4 + $0x10] sm:$0xff] %vm473_vm0, %v3202_v1  ;;  %477 = vst.msk [vmem:[#allocation4 + $0x18] sm:$0xff] %vm473_vm0, %v3202_v1  ;;  %2497 = vmatpush3.bf16.msra.mxu0 %v2808_v2  ;;  %v2810_v4 = vld [vmem:[%s3507_s16] sm:$0xff]  }
  0xa2   : > { %478 = vst.msk [vmem:[#allocation4 + $0x20] sm:$0xff] %vm473_vm0, %v3202_v1  ;;  %479 = vst.msk [vmem:[#allocation4 + $0x28] sm:$0xff] %vm473_vm0, %v3202_v1  ;;  %2498 = vmatprep.subr.bf16.mxu0 %v3201_v0 }
  0xa3   : > { %480 = vst.msk [vmem:[#allocation4 + $0x30] sm:$0xff] %vm473_vm0, %v3202_v1  ;;  %481 = vst.msk [vmem:[#allocation4 + $0x38] sm:$0xff] %vm473_vm0, %v3202_v1 }
  0xa4   : > { %482 = vst.msk [vmem:[#allocation5] sm:$0xff] %vm473_vm0, %v3201_v0  ;;  %483 = vst.msk [vmem:[#allocation5 + $0x8] sm:$0xff] %vm473_vm0, %v3201_v0 }
  0xa5   : > { %484 = vst.msk [vmem:[#allocation5 + $0x10] sm:$0xff] %vm473_vm0, %v3201_v0  ;;  %485 = vst.msk [vmem:[#allocation5 + $0x18] sm:$0xff] %vm473_vm0, %v3201_v0  ;;  %2499 = vmatpush3.bf16.msra.mxu0 %v2809_v3 }
  0xa6   : > { %486 = vst.msk [vmem:[#allocation5 + $0x20] sm:$0xff] %vm473_vm0, %v3201_v0  ;;  %487 = vst.msk [vmem:[#allocation5 + $0x28] sm:$0xff] %vm473_vm0, %v3201_v0 }
  0xa7   : > { %488 = vst.msk [vmem:[#allocation5 + $0x30] sm:$0xff] %vm473_vm0, %v3201_v0  ;;  %489 = vst.msk [vmem:[#allocation5 + $0x38] sm:$0xff] %vm473_vm0, %v3201_v0 }
  0xa8   : > { %490 = vst.msk [vmem:[#allocation3] sm:$0xff] %vm415_vm2, %v3201_v0  ;;  %491 = vst.msk [vmem:[#allocation3 + $0x8] sm:$0xff] %vm415_vm2, %v3201_v0  ;;  %2501 = vmatmul.mubr.msk.bf16.vlgmr.msra.gmra.mxu0 %vm415_vm2, %v2810_v4 }
 0x168   : > { %v453_v5 = vpop.f32.mrf.mxu0 }
 0x169   : > { %v460_v6 = vmul.f32 0.17677669, %v453_v5 }
 0x16a   : > { %v2502_v7 = vpop.f32.mrf.mxu0 }
 0x16b   : > { %v2451_v8 = vpack.c.bf16 %v460_v6, %v460_v6 }
 0x16c   : > { %v456_v9 = vpop.f32.mrf.mxu0 }
 0x16d   : > { %471 = vst.msk [vmem:[#allocation2] sm:$0xf] %vm470_vm3, %v2451_v8  ;;  %v461_v10 = vmul.f32 0.17677669, %v456_v9 }
 0x16e   : > { %v2503_v11 = vpop.f32.mrf.mxu0 }
 0x16f   : > { %v2452_v12 = vpack.c.bf16 %v461_v10, %v461_v10 }
 0x171   : > { %472 = vst.msk [vmem:[#allocation2 + $0x4] sm:$0xf] %vm470_vm3, %v2452_v12 }
 0x172 PF: > { %s492_s13 = sadd.s32 15, %s3531_s17 }
 0x173   : > { %p2407_p1 = scmp.gt.s32.totalorder %s3534_s4, %s492_s13 }
 0x174   : > { %s566_s14 = sadd.s32 (!%p2407_p1), 15, %s3534_s4 }
 0x175   : > { %496 = sbr.rel (%p2407_p1) target bundleno = 3337 (0xd09), region = 72  ;;  %p2412_p13 = scmp.le.s32.totalorder (!%p2407_p1), %s566_s14, %s3531_s17 }
 0x17a   : > { %v2811_v13 = vld [vmem:[#allocation12 + $0x8] sm:$0xff]   ;;  %v3204_v14 = vmov 0.0   ;;  %v2812_v15 = vld [vmem:[#allocation12] sm:$0xff]   ;;  %vm3205_vm4 = vmmov 0   ;;  %vm520_vm5 = vcmask 261120   ;;  %s3209_s29 = smov (!%p2412_p13), 96  }
 0x17b   : > { %2504 = vmatprep.subr.bf16.mxu0 %v3204_v14  ;;  %2508 = vmatprep.mubr.msk.bf16.mxu0 %vm3205_vm4, %v3204_v14  ;;  %v2813_v16 = vld [vmem:[%s336_s28] sm:$0xff]   ;;  %s3210_s6 = smov (!%p2412_p13), 120   ;;  %s3211_s16 = smov (!%p2412_p13), 112  }
 0x17c   : > { %2505 = vmatpush3.bf16.msra.mxu0 %v2811_v13  ;;  %s3212_s18 = smov (!%p2412_p13), 104   ;;  %s3213_s10 = smov (!%p2412_p13), 88  }
 0x17d   : > { %2506 = vmatprep.subr.bf16.mxu0 %v3204_v14  ;;  %s3214_s15 = smov (!%p2412_p13), 80   ;;  %s3215_s3 = smov (!%p2412_p13), 72  }
 0x17e   : > { %s3216_s2 = smov (!%p2412_p13), 8   ;;  %s3217_s21 = smov (!%p2412_p13), 16  }
 0x17f   : > { %s3218_s28 = smov (!%p2412_p13), 24  }
 0x180   : > { %2507 = vmatpush3.bf16.msra.mxu0 %v2812_v15 }
 0x183   : > { %2509 = vmatmul.mubr.msk.bf16.vlgmr.msra.gmra.mxu0 %vm520_vm5, %v2813_v16 }
 0x243   : > { %v558_v17 = vpop.f32.mrf.mxu0 }
 0x245   : > { %v2510_v18 = vpop.f32.mrf.mxu0  ;;  %570 = sbr.rel (%p2412_p13) target bundleno = 1959 (0x7a7), region = 76 }
 0x247   : > { %v561_v19 = vpop.f32.mrf.mxu0 }
 0x248   : > { %v3561_v20 = vpack.c.bf16 %v561_v19, %v558_v17 }
 0x249   : > { %v2511_v21 = vpop.f32.mrf.mxu0 }
 0x24a   : > { %vm590_vm6 = vcmask 64512   ;;  %v3206_v22 = vmov 0.0   ;;  %vm3207_vm7 = vmmov 0   ;;  %v2816_v24 = vld [vmem:[#allocation2] sm:$0xff]   ;;  %v571_v25 = vlaneseq  ;;  %v3599_v43 = vld [vmem:[#allocation4] sm:$0xff] }
 0x24b   : > { %2512 = vmatprep.subr.bf16.mxu0 %v3206_v22  ;;  %v595_v23 = vsel %vm590_vm6, %v3561_v20, 0  ;;  %2514 = vmatprep.mubr.msk.bf16.mxu0 %vm3207_vm7, %v3206_v22  ;;  %v574_v28 = vstv %s3531_s17  ;;  %v579_v29 = vstv %s3534_s4  ;;  %vm642_vm9 = vcmask 130048   ;;  %v3604_v46 = vld [vmem:[#allocation4 + $0x8] sm:$0xff] }
 0x24c   : > { %2513 = vmatpush3.bf16.xpose.msra.mxu0 %v595_v23  ;;  %2518 = vmatprep.subr.bf16.mxu1 %v3206_v22  ;;  %v572_v26 = vshrl.u32 %v571_v25, 7  ;;  %v578_v27 = vand.u32 127, %v571_v25  ;;  %v3208_v42 = vmov 0   ;;  %vm685_vm11 = vcmask 7168   ;;  %v2817_v52 = vld [vmem:[#allocation2] sm:$0xff]  }
 0x24d   : > { %2520 = vmatprep.mubr.msk.bf16.mxu1 %vm3207_vm7, %v3206_v22  ;;  %2530 = vmatprep.subr.bf16.mxu0 %v3206_v22  ;;  %v2818_v53 = vld [vmem:[#allocation2] sm:$0xff]   ;;  %vm937_vm12 = vcmask 130112   ;;  %vm1122_vm13 = vcmask 195712   ;;  %vm1307_vm14 = vcmask 261312  }
 0x24e   : > { %v3580_v30 = vadd.s32 %v574_v28, %v572_v26  ;;  %v3582_v31 = vadd.s32 %v579_v29, %v578_v27  ;;  %v573_v32 = vadd.s32 8, %v572_v26  ;;  %2814 = vset.pattern.permute.xlu1 %v3208_v42  ;;  %2815 = vset.pattern.permute.xlu0 %v3208_v42  ;;  %v2819_v54 = vld [vmem:[#allocation2] sm:$0xff]   ;;  %v818_v42 = vld [vmem:[#allocation4 + $0x10] sm:$0xff] }
 0x250   : > { %vm581_vm8 = vcmp.le.s32.totalorder %v3582_v31, %v3580_v30  ;;  %v3586_v33 = vadd.s32 %v574_v28, %v573_v32 }
 0x252   : > { %vm582_vm10 = vcmp.le.s32.totalorder %v3582_v31, %v3586_v33 }
 0x253   : > { %2515 = vmatmul.mubr.msk.bf16.vlgmr.msra.gmra.mxu0 %vm590_vm6, %v2816_v24 }
 0x254   : > { %2532 = vmatprep.mubr.msk.bf16.mxu0 %vm3207_vm7, %v3206_v22 }
 0x313   : > { %v631_v34 = vpop.f32.mrf.mxu0 }
 0x314   : > { %v638_v35 = vsel %vm581_vm8, %v631_v34, -1e+30 }
 0x315   : > { %v2516_v36 = vpop.f32.mrf.mxu0  ;;  %v643_v37 = vsel %vm642_vm9, %v638_v35, -inf }
 0x316   : > { %644 = vmax.xlane.f32.xlu0 %v643_v37 }
 0x317   : > { %v634_v38 = vpop.f32.mrf.mxu0 }
 0x318   : > { %v639_v39 = vsel %vm582_vm10, %v634_v38, -1e+30 }
 0x319   : > { %v2517_v40 = vpop.f32.mrf.mxu0  ;;  %v646_v41 = vsel %vm642_vm9, %v639_v39, -inf }
 0x31a   : > { %647 = vmax.xlane.f32.xlu0 %v646_v41 }
 0x330   : > { %704 = vrot.lane.b32.xlu0 %v3561_v20, %s3209_s29 }
 0x39f   : > { %v645_v44 = vpop.xlane.xlu0 %644 }
 0x3a0   : > { %v3602_v45 = vmax.f32 %v3599_v43, %v645_v44 }
 0x3a2   : > { %v651_v47 = vsub.f32 %v3599_v43, %v3602_v45  ;;  %755 = vst.msk [vmem:[#allocation4] sm:$0xff] %vm685_vm11, %v3602_v45  ;;  %659 = vperm.xlu1 %2814, %v3602_v45  }
 0x3a3   : > { %v648_v48 = vpop.xlane.xlu0 %647 }
 0x3a4   : > { %v3612_v49 = vmax.f32 %v3604_v46, %v648_v48  ;;  %v819_v48 = vld [vmem:[#allocation4 + $0x18] sm:$0xff] }
 0x3a6   : > { %v652_v50 = vsub.f32 %v3604_v46, %v3612_v49  ;;  %756 = vst.msk [vmem:[#allocation4 + $0x8] sm:$0xff] %vm685_vm11, %v3612_v49  ;;  %664 = vperm.xlu1 %2814, %v3612_v49  }
 0x3a7   : > { %v705_v51 = vpop.permute.xlu0 %704 }
 0x3a8   : > { %2519 = vmatpush3.bf16.msra.mxu1 %v705_v51  ;;  %v655_v43 = vmul.f32 1.442695, %v652_v50 }
 0x3a9   : > { %2524 = vmatprep.subr.bf16.mxu1 %v3206_v22 }
 0x3aa   : > { %766 = vrot.lane.b32.xlu1 %v3561_v20, %s3210_s6 }
 0x3ae   : > { %764 = vrot.lane.b32.xlu1 %v2817_v52, %s3210_s6 }
 0x3b2   : > { %951 = vrot.lane.b32.xlu1 %v3561_v20, %s3211_s16 }
 0x3b6   : > { %949 = vrot.lane.b32.xlu1 %v2818_v53, %s3211_s16  ;;  %v1003_v53 = vld [vmem:[#allocation4 + $0x20] sm:$0xff] }
 0x3ba   : > { %1136 = vrot.lane.b32.xlu1 %v3561_v20, %s3212_s18 }
 0x3be   : > { %1134 = vrot.lane.b32.xlu1 %v2819_v54, %s3212_s18 }
 0x41d   : > { %v660_v55 = vpop.permute.xlu1 %659 }
 0x41e   : > { %v667_v56 = vsub.f32 %v638_v35, %v660_v55  ;;  %v1004_v55 = vld [vmem:[#allocation4 + $0x28] sm:$0xff] }
 0x420   : > { %v669_v57 = vmul.f32 1.442695, %v667_v56 }
 0x421   : > { %v665_v58 = vpop.permute.xlu1 %664 }
 0x422   : > { %v668_v59 = vsub.f32 %v639_v39, %v665_v58  ;;  %2820 = vpow2.f32 %v669_v57  ;;  %v3693_v58 = vld [vmem:[#allocation4 + $0x30] sm:$0xff] }
 0x424   : > { %v671_v60 = vmul.f32 1.442695, %v668_v59 }
 0x425   : > { %v767_v61 = vpop.permute.xlu1 %766 }
 0x426   : > { %2822 = vpow2.f32 %v671_v60  ;;  %v772_v1 = vsel %vm590_vm6, %v767_v61, 0 }
 0x429   : > { %v765_v62 = vpop.permute.xlu1 %764 }
 0x42d   : > { %v952_v3 = vpop.permute.xlu1 %951 }
 0x42e   : > { %v957_v5 = vsel %vm590_vm6, %v952_v3, 0 }
 0x42f   : > { %v3623_v63 = vpop.eup %2820 }
 0x431   : > { %v950_v4 = vpop.permute.xlu1 %949 }
 0x433   : > { %v3625_v0 = vpop.eup %2822 }
 0x434   : > { %v702_v2 = vpack.c.bf16 %v3625_v0, %v3623_v63  ;;  %v680_v45 = vsel %vm642_vm9, %v3625_v0, 0.0 }
 0x435   : > { %v1137_v6 = vpop.permute.xlu1 %1136 }
 0x436   : > { %2521 = vmatmul.mubr.msk.bf16.vlgmr.msra.gmra.mxu1 %vm642_vm9, %v702_v2  ;;  %v1142_v7 = vsel %vm590_vm6, %v1137_v6, 0  ;;  %v653_v6 = vmul.f32 1.442695, %v651_v47 }
 0x437   : > { %2525 = vmatpush3.bf16.xpose.msra.mxu1 %v772_v1  ;;  %2526 = vmatprep.mubr.msk.bf16.mxu1 %vm3207_vm7, %v3206_v22 }
 0x438   : > { %2536 = vmatprep.subr.bf16.mxu1 %v3206_v22  ;;  %2824 = vpow2.f32 %v653_v6 }
 0x439   : > { %v1135_v8 = vpop.permute.xlu1 %1134 }
 0x43e   : > { %2527 = vmatmul.mubr.msk.bf16.vlgmr.msra.gmra.mxu1 %vm590_vm6, %v765_v62  ;;  %v3699_v62 = vld [vmem:[#allocation4 + $0x38] sm:$0xff] }
 0x43f   : > { %2537 = vmatpush3.bf16.xpose.msra.mxu1 %v957_v5  ;;  %2538 = vmatprep.mubr.msk.bf16.mxu1 %vm3207_vm7, %v3206_v22  ;;  %v677_v5 = vsel %vm642_vm9, %v3623_v63, 0.0 }
 0x440   : > { %2548 = vmatprep.subr.bf16.mxu1 %v3206_v22 }
 0x446   : > { %2539 = vmatmul.mubr.msk.bf16.vlgmr.msra.gmra.mxu1 %vm590_vm6, %v950_v4 }
 0x447   : > { %2549 = vmatpush3.bf16.xpose.msra.mxu1 %v1142_v7  ;;  %2550 = vmatprep.mubr.msk.bf16.mxu1 %vm3207_vm7, %v3206_v22 }
 0x44e   : > { %2551 = vmatmul.mubr.msk.bf16.vlgmr.msra.gmra.mxu1 %vm590_vm6, %v1135_v8 }
 0x4f6   : > { %v3644_v9 = vpop.f32.mrf.mxu1 }
 0x4f8   : > { %v2522_v10 = vpop.f32.mrf.mxu1 }
 0x4fa   : > { %v3646_v11 = vpop.f32.mrf.mxu1 }
 0x4fc   : > { %v2523_v12 = vpop.f32.mrf.mxu1 }
 0x4fe   : > { %v808_v13 = vpop.f32.mrf.mxu1 }
 0x4ff   : > { %v3651_v14 = vsel %vm581_vm8, %v808_v13, -1e+30  ;;  %v3722_v13 = vpop.eup %2824 }
 0x500   : > { %v2528_v15 = vpop.f32.mrf.mxu1  ;;  %v820_v16 = vsel %vm642_vm9, %v3651_v14, -inf }
 0x501   : > { %821 = vmax.xlane.f32.xlu0 %v820_v16 }
 0x502   : > { %v811_v17 = vpop.f32.mrf.mxu1 }
 0x503   : > { %v3658_v18 = vsel %vm582_vm10, %v811_v17, -1e+30 }
 0x504   : > { %v2529_v19 = vpop.f32.mrf.mxu1  ;;  %v823_v21 = vsel %vm642_vm9, %v3658_v18, -inf }
 0x505   : > { %824 = vmax.xlane.f32.xlu1 %v823_v21 }
 0x506   : > { %v993_v23 = vpop.f32.mrf.mxu1 }
 0x507   : > { %v3665_v24 = vsel %vm581_vm8, %v993_v23, -1e+30 }
 0x508   : > { %v2540_v25 = vpop.f32.mrf.mxu1  ;;  %v1005_v26 = vsel %vm642_vm9, %v3665_v24, -inf }
 0x509   : > { %1006 = vmax.xlane.f32.xlu0 %v1005_v26 }
 0x50a   : > { %v996_v27 = vpop.f32.mrf.mxu1 }
 0x50b   : > { %v3672_v28 = vsel %vm582_vm10, %v996_v27, -1e+30 }
 0x50c   : > { %v2541_v29 = vpop.f32.mrf.mxu1  ;;  %v1008_v32 = vsel %vm642_vm9, %v3672_v28, -inf }
 0x50d   : > { %1009 = vmax.xlane.f32.xlu0 %v1008_v32 }
 0x50e   : > { %v1178_v34 = vpop.f32.mrf.mxu1 }
 0x50f   : > { %v3679_v35 = vsel %vm581_vm8, %v1178_v34, -1e+30 }
 0x510   : > { %v2552_v36 = vpop.f32.mrf.mxu1  ;;  %v1190_v37 = vsel %vm642_vm9, %v3679_v35, -inf }
 0x511   : > { %1191 = vmax.xlane.f32.xlu1 %v1190_v37 }
 0x512   : > { %v1181_v38 = vpop.f32.mrf.mxu1 }
 0x513   : > { %v3686_v39 = vsel %vm582_vm10, %v1181_v38, -1e+30 }
 0x514   : > { %v2553_v40 = vpop.f32.mrf.mxu1  ;;  %v1193_v41 = vsel %vm642_vm9, %v3686_v39, -inf }
 0x515   : > { %1194 = vmax.xlane.f32.xlu0 %v1193_v41 }
 0x58a   : > { %v822_v30 = vpop.xlane.xlu0 %821 }
 0x58b   : > { %v826_v44 = vmax.f32 %v818_v42, %v822_v30 }
 0x58d   : > { %940 = vst.msk [vmem:[#allocation4 + $0x10] sm:$0xff] %vm685_vm11, %v826_v44  ;;  %836 = vperm.xlu1 %2814, %v826_v44   ;;  %v828_v7 = vsub.f32 %v818_v42, %v826_v44 }
 0x58e   : > { %v825_v51 = vpop.xlane.xlu1 %824 }
 0x58f   : > { %v827_v52 = vmax.f32 %v819_v48, %v825_v51  ;;  %v830_v8 = vmul.f32 1.442695, %v828_v7 }
 0x591   : > { %v829_v54 = vsub.f32 %v819_v48, %v827_v52  ;;  %941 = vst.msk [vmem:[#allocation4 + $0x18] sm:$0xff] %vm685_vm11, %v827_v52  ;;  %841 = vperm.xlu0 %2815, %v827_v52   ;;  %2826 = vpow2.f32 %v830_v8  ;;  %v674_v8 = vld [vmem:[#allocation5 + $0x8] sm:$0xff] }
 0x592   : > { %v1007_v31 = vpop.xlane.xlu0 %1006 }
 0x593   : > { %v1011_v33 = vmax.f32 %v1003_v53, %v1007_v31  ;;  %v832_v47 = vmul.f32 1.442695, %v829_v54 }
 0x595   : > { %1125 = vst.msk [vmem:[#allocation4 + $0x20] sm:$0xff] %vm685_vm11, %v1011_v33  ;;  %1021 = vperm.xlu1 %2814, %v1011_v33   ;;  %v1013_v10 = vsub.f32 %v1003_v53, %v1011_v33 }
 0x596   : > { %v1010_v56 = vpop.xlane.xlu0 %1009 }
 0x597   : > { %v1012_v57 = vmax.f32 %v1004_v55, %v1010_v56  ;;  %v1015_v12 = vmul.f32 1.442695, %v1013_v10 }
 0x599   : > { %v1014_v59 = vsub.f32 %v1004_v55, %v1012_v57  ;;  %1126 = vst.msk [vmem:[#allocation4 + $0x28] sm:$0xff] %vm685_vm11, %v1012_v57  ;;  %1026 = vperm.xlu1 %2814, %v1012_v57   ;;  %2828 = vpow2.f32 %v1015_v12  ;;  %v673_v57 = vld [vmem:[#allocation5] sm:$0xff] }
 0x59a   : > { %v1192_v60 = vpop.xlane.xlu1 %1191  ;;  %2830 = vpow2.f32 %v655_v43 }
 0x59b   : > { %v3697_v61 = vmax.f32 %v3693_v58, %v1192_v60  ;;  %2832 = vpow2.f32 %v832_v47  ;;  %v1017_v16 = vmul.f32 1.442695, %v1014_v59  ;;  %v675_v59 = vmul.f32 %v3722_v13, %v673_v57 }
 0x59d   : > { %880 = vrot.lane.b32.xlu1 %v3561_v20, %s3213_s10  ;;  %v1198_v1 = vsub.f32 %v3693_v58, %v3697_v61  ;;  %1310 = vst.msk [vmem:[#allocation4 + $0x30] sm:$0xff] %vm685_vm11, %v3697_v61  ;;  %2834 = vpow2.f32 %v1017_v16 }
 0x59e   : > { %v1195_v2 = vpop.xlane.xlu0 %1194  ;;  %v3725_v15 = vpop.eup %2826 }
 0x59f   : > { %v3707_v3 = vmax.f32 %v3699_v62, %v1195_v2 }
 0x5a1   : > { %v1199_v4 = vsub.f32 %v3699_v62, %v3707_v3  ;;  %1311 = vst.msk [vmem:[#allocation4 + $0x38] sm:$0xff] %vm685_vm11, %v3707_v3  ;;  %1206 = vperm.xlu1 %2814, %v3697_v61  }
 0x5a5   : > { %1211 = vperm.xlu1 %2814, %v3707_v3  }
 0x5a6   : > { %v3728_v63 = vpop.eup %2828 }
 0x5a7   : > { %v3736_v17 = vpop.eup %2830 }
 0x5a8   : > { %v3739_v19 = vpop.eup %2832  ;;  %v676_v10 = vmul.f32 %v3736_v17, %v674_v8 }
 0x5a9   : > { %1065 = vrot.lane.b32.xlu1 %v3561_v20, %s3214_s15 }
 0x5aa   : > { %v3742_v21 = vpop.eup %2834 }
 0x5ad   : > { %1250 = vrot.lane.b32.xlu1 %v3561_v20, %s3215_s3 }
 0x5b0   : > { %678 = vadd.xlane.f32.xlu0 %v677_v5  ;;  %v688_v5 = vld [vmem:[#allocation3] sm:$0xff] }
 0x5c6   : > { %692 = vperm.xlu0 %2815, %v3722_v13  }
 0x5ca   : > { %869 = vperm.xlu0 %2815, %v3725_v15  }
 0x5ce   : > { %1054 = vperm.xlu0 %2815, %v3728_v63  }
 0x5d1   : > { %681 = vadd.xlane.f32.xlu1 %v680_v45  ;;  %v689_v45 = vld [vmem:[#allocation3 + $0x8] sm:$0xff] }
 0x5e2   : > { %697 = vperm.xlu1 %2814, %v3736_v17  }
 0x5e6   : > { %874 = vperm.xlu1 %2814, %v3739_v19  }
 0x5ea   : > { %1059 = vperm.xlu1 %2814, %v3742_v21  }
 0x608   : > { %v837_v46 = vpop.permute.xlu1 %836 }
 0x609   : > { %v844_v49 = vsub.f32 %v3651_v14, %v837_v46 }
 0x60b   : > { %v846_v50 = vmul.f32 1.442695, %v844_v49 }
 0x60c   : > { %v842_v0 = vpop.permute.xlu0 %841 }
 0x60d   : > { %2836 = vpow2.f32 %v846_v50  ;;  %v845_v23 = vsub.f32 %v3658_v18, %v842_v0 }
 0x60f   : > { %v848_v25 = vmul.f32 1.442695, %v845_v23 }
 0x610   : > { %v1022_v26 = vpop.permute.xlu1 %1021 }
 0x611   : > { %2838 = vpow2.f32 %v848_v25  ;;  %v1029_v27 = vsub.f32 %v3665_v24, %v1022_v26  ;;  %v852_v25 = vld [vmem:[#allocation5 + $0x18] sm:$0xff] }
 0x613   : > { %v1031_v29 = vmul.f32 1.442695, %v1029_v27  ;;  %v854_v27 = vmul.f32 %v3739_v19, %v852_v25 }
 0x614   : > { %v1027_v32 = vpop.permute.xlu1 %1026 }
 0x615   : > { %2840 = vpow2.f32 %v1031_v29  ;;  %v1030_v34 = vsub.f32 %v3672_v28, %v1027_v32 }
 0x617   : > { %v1033_v36 = vmul.f32 1.442695, %v1030_v34 }
 0x618   : > { %v881_v37 = vpop.permute.xlu1 %880 }
 0x619   : > { %2842 = vpow2.f32 %v1033_v36  ;;  %2531 = vmatpush3.bf16.msra.mxu0 %v881_v37  ;;  %v1037_v37 = vld [vmem:[#allocation5 + $0x28] sm:$0xff] }
 0x61a   : > { %v2837_v14 = vpop.eup %2836  ;;  %2542 = vmatprep.subr.bf16.mxu0 %v3206_v22 }
 0x61b   : > { %v855_v38 = vsel %vm642_vm9, %v2837_v14, 0.0 }
 0x61c   : > { %v1207_v18 = vpop.permute.xlu1 %1206  ;;  %856 = vadd.xlane.f32.xlu0 %v855_v38 }
 0x61d   : > { %v1214_v40 = vsub.f32 %v3679_v35, %v1207_v18 }
 0x61e   : > { %v2839_v41 = vpop.eup %2838 }
 0x61f   : > { %v858_v24 = vsel %vm642_vm9, %v2839_v41, 0.0  ;;  %v879_v42 = vpack.c.bf16 %v2839_v41, %v2837_v14  ;;  %v1216_v30 = vmul.f32 1.442695, %v1214_v40 }
 0x620   : > { %v1212_v44 = vpop.permute.xlu1 %1211  ;;  %859 = vadd.xlane.f32.xlu1 %v858_v24 }
 0x621   : > { %v1215_v28 = vsub.f32 %v3686_v39, %v1212_v44  ;;  %2533 = vmatmul.mubr.msk.bf16.vlgmr.msra.gmra.mxu0 %vm642_vm9, %v879_v42  ;;  %2844 = vpow2.f32 %v1216_v30 }
 0x622   : > { %v2841_v48 = vpop.eup %2840  ;;  %2544 = vmatprep.mubr.msk.bf16.mxu0 %vm3207_vm7, %v3206_v22 }
 0x623   : > { %v1218_v51 = vmul.f32 1.442695, %v1215_v28  ;;  %v1040_v52 = vsel %vm642_vm9, %v2841_v48, 0.0 }
 0x624   : > { %1041 = vadd.xlane.f32.xlu0 %v1040_v52  ;;  %v1066_v35 = vpop.permute.xlu1 %1065 }
 0x625   : > { %2846 = vpow2.f32 %v1218_v51  ;;  %2543 = vmatpush3.bf16.msra.mxu0 %v1066_v35  ;;  %v1200_v35 = vmul.f32 1.442695, %v1198_v1 }
 0x626   : > { %v2843_v53 = vpop.eup %2842  ;;  %2554 = vmatprep.subr.bf16.mxu0 %v3206_v22 }
 0x627   : > { %v1043_v54 = vsel %vm642_vm9, %v2843_v53, 0.0  ;;  %v1064_v39 = vpack.c.bf16 %v2843_v53, %v2841_v48  ;;  %2848 = vpow2.f32 %v1200_v35  ;;  %v1202_v53 = vmul.f32 1.442695, %v1199_v4 }
 0x628   : > { %1044 = vadd.xlane.f32.xlu1 %v1043_v54  ;;  %v1251_v31 = vpop.permute.xlu1 %1250 }
 0x629   : > { %2545 = vmatmul.mubr.msk.bf16.vlgmr.msra.gmra.mxu0 %vm642_vm9, %v1064_v39  ;;  %2850 = vpow2.f32 %v1202_v53 }
 0x62a   : > { %2555 = vmatpush3.bf16.msra.mxu0 %v1251_v31  ;;  %2556 = vmatprep.mubr.msk.bf16.mxu0 %vm3207_vm7, %v3206_v22 }
 0x62e   : > { %v3763_v33 = vpop.eup %2844 }
 0x62f   : > { %v1225_v52 = vsel %vm642_vm9, %v3763_v33, 0.0 }
 0x632   : > { %v3765_v55 = vpop.eup %2846 }
 0x633   : > { %v1249_v56 = vpack.c.bf16 %v3765_v55, %v3763_v33  ;;  %v1228_v54 = vsel %vm642_vm9, %v3765_v55, 0.0 }
 0x634   : > { %v2849_v39 = vpop.eup %2848 }
 0x635   : > { %2557 = vmatmul.mubr.msk.bf16.vlgmr.msra.gmra.mxu0 %vm642_vm9, %v1249_v56 }
 0x636   : > { %v2851_v31 = vpop.eup %2850 }
 0x639   : > { %v679_v60 = vpop.xlane.xlu0 %678 }
 0x63a   : > { %v683_v2 = vadd.f32 %v679_v60, %v675_v59 }
 0x63c   : > { %686 = vst.msk [vmem:[#allocation5] sm:$0xff] %vm685_vm11, %v683_v2  ;;  %v1221_v2 = vld [vmem:[#allocation5 + $0x30] sm:$0xff] }
 0x641   : > { %v693_v6 = vpop.permute.xlu0 %692 }
 0x642   : > { %v700_v7 = vmul.f32 %v693_v6, %v688_v5  ;;  %v1223_v5 = vmul.f32 %v2849_v39, %v1221_v2 }
 0x644   : > { %v751_v22 = vadd.f32 %v3644_v9, %v700_v7  ;;  %v851_v9 = vld [vmem:[#allocation5 + $0x10] sm:$0xff] }
 0x645   : > { %v870_v46 = vpop.permute.xlu0 %869  ;;  %v853_v0 = vmul.f32 %v3725_v15, %v851_v9  ;;  %v1039_v15 = vmul.f32 %v3742_v21, %v1037_v37 }
 0x646   : > { %753 = vst.msk [vmem:[#allocation3] sm:$0xff] %vm590_vm6, %v751_v22 }
 0x649   : > { %v3778_v50 = vpop.permute.xlu0 %1054 }
 0x64d   : > { %v865_v58 = vld [vmem:[#allocation3] sm:$0xff] }
 0x64e   : > { %v877_v61 = vmul.f32 %v870_v46, %v865_v58 }
 0x65a   : > { %v682_v12 = vpop.xlane.xlu1 %681 }
 0x65b   : > { %v684_v43 = vadd.f32 %v682_v12, %v676_v10 }
 0x65d   : > { %687 = vst.msk [vmem:[#allocation5 + $0x8] sm:$0xff] %vm685_vm11, %v684_v43 }
 0x65e   : > { %v698_v13 = vpop.permute.xlu1 %697 }
 0x65f   : > { %v701_v47 = vmul.f32 %v698_v13, %v689_v45  ;;  %v1222_v45 = vld [vmem:[#allocation5 + $0x38] sm:$0xff] }
 0x660   : > { %v1224_v46 = vmul.f32 %v2851_v31, %v1222_v45 }
 0x661   : > { %v752_v16 = vadd.f32 %v3646_v11, %v701_v47  ;;  %v1036_v11 = vld [vmem:[#allocation5 + $0x20] sm:$0xff] }
 0x662   : > { %v875_v49 = vpop.permute.xlu1 %874  ;;  %v1038_v34 = vmul.f32 %v3728_v63, %v1036_v11 }
 0x663   : > { %754 = vst.msk [vmem:[#allocation3 + $0x8] sm:$0xff] %vm590_vm6, %v752_v16 }
 0x666   : > { %v3781_v23 = vpop.permute.xlu1 %1059 }
 0x66a   : > { %v866_v1 = vld [vmem:[#allocation3 + $0x8] sm:$0xff] }
 0x66b   : > { %v878_v3 = vmul.f32 %v875_v49, %v866_v1 }
 0x6a5   : > { %v857_v17 = vpop.xlane.xlu0 %856 }
 0x6a6   : > { %v861_v26 = vadd.f32 %v857_v17, %v853_v0 }
 0x6a8   : > { %863 = vst.msk [vmem:[#allocation5 + $0x10] sm:$0xff] %vm685_vm11, %v861_v26 }
 0x6a9   : > { %v860_v29 = vpop.xlane.xlu1 %859 }
 0x6aa   : > { %v862_v32 = vadd.f32 %v860_v29, %v854_v27 }
 0x6ac   : > { %864 = vst.msk [vmem:[#allocation5 + $0x18] sm:$0xff] %vm685_vm11, %v862_v32 }
 0x6ad   : > { %v1042_v36 = vpop.xlane.xlu0 %1041 }
 0x6ae   : > { %v1046_v14 = vadd.f32 %v1042_v36, %v1038_v34 }
 0x6b0   : > { %1048 = vst.msk [vmem:[#allocation5 + $0x20] sm:$0xff] %vm685_vm11, %v1046_v14 }
 0x6b1   : > { %v1045_v38 = vpop.xlane.xlu1 %1044 }
 0x6b2   : > { %v1047_v18 = vadd.f32 %v1045_v38, %v1039_v15 }
 0x6b4   : > { %1049 = vst.msk [vmem:[#allocation5 + $0x28] sm:$0xff] %vm685_vm11, %v1047_v18 }
 0x6e1   : > { %v920_v40 = vpop.f32.mrf.mxu0 }
 0x6e2   : > { %929 = vrot.lane.b32.xlu0 %v920_v40, %s3216_s2 }
 0x6e3   : > { %v2534_v19 = vpop.f32.mrf.mxu0 }
 0x6e5   : > { %v923_v41 = vpop.f32.mrf.mxu0 }
 0x6e6   : > { %931 = vrot.lane.b32.xlu1 %v923_v41, %s3216_s2 }
 0x6e7   : > { %v2535_v24 = vpop.f32.mrf.mxu0 }
 0x6e9   : > { %v1105_v42 = vpop.f32.mrf.mxu0 }
 0x6eb   : > { %v2546_v63 = vpop.f32.mrf.mxu0 }
 0x6ed   : > { %v1108_v30 = vpop.f32.mrf.mxu0 }
 0x6ee   : > { %1116 = vrot.lane.b32.xlu1 %v1108_v30, %s3217_s21 }
 0x6ef   : > { %v2547_v44 = vpop.f32.mrf.mxu0 }
 0x6f5   : > { %v1290_v28 = vpop.f32.mrf.mxu0 }
 0x6f7   : > { %v2558_v48 = vpop.f32.mrf.mxu0 }
 0x6f9   : > { %v1293_v21 = vpop.f32.mrf.mxu0 }
 0x6fb   : > { %v2559_v51 = vpop.f32.mrf.mxu0 }
 0x701   : > { %1226 = vadd.xlane.f32.xlu0 %v1225_v52 }
 0x712   : > { %1229 = vadd.xlane.f32.xlu1 %v1228_v54 }
 0x717   : > { %1114 = vrot.lane.b32.xlu0 %v1105_v42, %s3217_s21 }
 0x71b   : > { %1239 = vperm.xlu0 %2815, %v2849_v39  }
 0x71f   : > { %1299 = vrot.lane.b32.xlu0 %v1290_v28, %s3218_s28 }
 0x723   : > { %1244 = vperm.xlu1 %2814, %v2851_v31  }
 0x727   : > { %1301 = vrot.lane.b32.xlu1 %v1293_v21, %s3218_s28 }
 0x754   : > { %v930_v33 = vpop.permute.xlu0 %929 }
 0x755   : > { %v935_v62 = vadd.f32 %v930_v33, %v877_v61 }
 0x757   : > { %938 = vst.msk [vmem:[#allocation3] sm:$0xff] %vm937_vm12, %v935_v62 }
 0x758   : > { %v932_v4 = vpop.permute.xlu1 %931 }
 0x759   : > { %v936_v55 = vadd.f32 %v932_v4, %v878_v3 }
 0x75b   : > { %939 = vst.msk [vmem:[#allocation3 + $0x8] sm:$0xff] %vm937_vm12, %v936_v55 }
 0x75e   : > { %v1050_v7 = vld [vmem:[#allocation3] sm:$0xff] }
 0x75f   : > { %v1062_v8 = vmul.f32 %v3778_v50, %v1050_v7 }
 0x760   : > { %v1117_v59 = vpop.permute.xlu1 %1116 }
 0x762   : > { %v1051_v56 = vld [vmem:[#allocation3 + $0x8] sm:$0xff] }
 0x763   : > { %v1063_v57 = vmul.f32 %v3781_v23, %v1051_v56 }
 0x765   : > { %v1121_v60 = vadd.f32 %v1117_v59, %v1063_v57 }
 0x767   : > { %1124 = vst.msk [vmem:[#allocation3 + $0x8] sm:$0xff] %vm1122_vm13, %v1121_v60 }
 0x76e   : > { %v1236_v17 = vld [vmem:[#allocation3 + $0x8] sm:$0xff] }
 0x78a   : > { %v1227_v6 = vpop.xlane.xlu0 %1226 }
 0x78b   : > { %v1231_v22 = vadd.f32 %v1227_v6, %v1223_v5 }
 0x78d   : > { %1233 = vst.msk [vmem:[#allocation5 + $0x30] sm:$0xff] %vm685_vm11, %v1231_v22 }
 0x78e   : > { %v1115_v10 = vpop.permute.xlu0 %1114 }
 0x78f   : > { %v1120_v12 = vadd.f32 %v1115_v10, %v1062_v8 }
 0x791   : > { %1123 = vst.msk [vmem:[#allocation3] sm:$0xff] %vm1122_vm13, %v1120_v12 }
 0x796   : > { %v1240_v43 = vpop.permute.xlu0 %1239 }
 0x798   : > { %v1235_v13 = vld [vmem:[#allocation3] sm:$0xff] }
 0x799   : > { %v1247_v47 = vmul.f32 %v1240_v43, %v1235_v13 }
 0x79a   : > { %v1300_v16 = vpop.permute.xlu0 %1299 }
 0x79b   : > { %v1305_v49 = vadd.f32 %v1300_v16, %v1247_v47  ;;  %v1230_v9 = vpop.xlane.xlu1 %1229 }
 0x79c   : > { %v1232_v0 = vadd.f32 %v1230_v9, %v1224_v46 }
 0x79d   : > { %1308 = vst.msk [vmem:[#allocation3] sm:$0xff] %vm1307_vm14, %v1305_v49 }
 0x79e   : > { %1234 = vst.msk [vmem:[#allocation5 + $0x38] sm:$0xff] %vm685_vm11, %v1232_v0 }
 0x79f   : > { %v1245_v23 = vpop.permute.xlu1 %1244 }
 0x7a0   : > { %v1248_v25 = vmul.f32 %v1245_v23, %v1236_v17 }
 0x7a3   : > { %v1302_v50 = vpop.permute.xlu1 %1301 }
 0x7a4   : > { %v1306_v26 = vadd.f32 %v1302_v50, %v1248_v25 }
 0x7a6   : > { %1309 = vst.msk [vmem:[#allocation3 + $0x8] sm:$0xff] %vm1307_vm14, %v1306_v26 }
 0x7a7 PF: > { %p2425_p9 = scmp.gt.s32.totalorder %s566_s14, %s3531_s17 }
 0x7a8   : > { %s3222_s5 = smov (!%p2425_p9), 96   ;;  %s3223_s12 = smov (!%p2425_p9), 120  }
 0x7a9   : > { %1315 = sbr.rel (%p2425_p9) target bundleno = 3337 (0xd09), region = 80  ;;  %s3224_s17 = smov (!%p2425_p9), 112  }
 0x7aa   : > { %s3225_s4 = smov (!%p2425_p9), 104   ;;  %s3226_s13 = smov (!%p2425_p9), 88  }
 0x7ab   : > { %s3227_s14 = smov (!%p2425_p9), 80   ;;  %s3228_s29 = smov (!%p2425_p9), 72  }
 0x7ac   : > { %s3229_s6 = smov (!%p2425_p9), 8   ;;  %s3230_s16 = smov (!%p2425_p9), 16  }
 0x7ad   : > { %s3231_s18 = smov (!%p2425_p9), 24  }
 0x7ae   : > { %vm1323_vm15 = vcmask 64512   ;;  %v3219_v27 = vmov 0.0   ;;  %vm3220_vm0 = vmmov 0   ;;  %v2854_v11 = vld [vmem:[#allocation2] sm:$0xff]   ;;  %vm1373_vm1 = vcmask 130048   ;;  %v3822_v18 = vld [vmem:[#allocation4] sm:$0xff] }
 0x7af   : > { %2560 = vmatprep.subr.bf16.mxu0 %v3219_v27  ;;  %v1328_v29 = vsel %vm1323_vm15, %v3561_v20, 0  ;;  %2562 = vmatprep.mubr.msk.bf16.mxu0 %vm3220_vm0, %v3219_v27  ;;  %v3221_v38 = vmov 0   ;;  %vm1416_vm2 = vcmask 7168   ;;  %v3827_v41 = vld [vmem:[#allocation4 + $0x8] sm:$0xff]  ;;  %v1547_v26 = vld [vmem:[#allocation4 + $0x10] sm:$0xff]  ;;  %vm1666_vm3 = vcmask 130112  }
 0x7b0   : > { %2561 = vmatpush3.bf16.xpose.msra.mxu0 %v1328_v29  ;;  %2566 = vmatprep.subr.bf16.mxu1 %v3219_v27  ;;  %v2855_v28 = vld [vmem:[#allocation2] sm:$0xff]   ;;  %vm1849_vm4 = vcmask 195712   ;;  %vm2032_vm5 = vcmask 261312  }
 0x7b1   : > { %2568 = vmatprep.mubr.msk.bf16.mxu1 %vm3220_vm0, %v3219_v27  ;;  %2578 = vmatprep.subr.bf16.mxu0 %v3219_v27  ;;  %v2856_v48 = vld [vmem:[#allocation2] sm:$0xff]  }
 0x7b2   : > { %2852 = vset.pattern.permute.xlu1 %v3221_v38  ;;  %2853 = vset.pattern.permute.xlu0 %v3221_v38  ;;  %v2857_v21 = vld [vmem:[#allocation2] sm:$0xff]  }
 0x7b7   : > { %2563 = vmatmul.mubr.msk.bf16.vlgmr.msra.gmra.mxu0 %vm1323_vm15, %v2854_v11 }
 0x7b8   : > { %2580 = vmatprep.mubr.msk.bf16.mxu0 %vm3220_vm0, %v3219_v27 }
 0x877   : > { %v1364_v32 = vpop.f32.mrf.mxu0 }
 0x878   : > { %v1374_v34 = vsel %vm1373_vm1, %v1364_v32, -inf }
 0x879   : > { %1375 = vmax.xlane.f32.xlu0 %v1374_v34  ;;  %v2564_v36 = vpop.f32.mrf.mxu0 }
 0x87b   : > { %v1367_v37 = vpop.f32.mrf.mxu0 }
 0x87c   : > { %v1377_v14 = vsel %vm1373_vm1, %v1367_v37, -inf }
 0x87d   : > { %1378 = vmax.xlane.f32.xlu0 %v1377_v14  ;;  %v2565_v15 = vpop.f32.mrf.mxu0 }
 0x893   : > { %1435 = vrot.lane.b32.xlu0 %v3561_v20, %s3222_s5 }
 0x902   : > { %v1376_v40 = vpop.xlane.xlu0 %1375 }
 0x903   : > { %v3825_v19 = vmax.f32 %v3822_v18, %v1376_v40  ;;  %v1731_v40 = vld [vmem:[#allocation4 + $0x28] sm:$0xff] }
 0x905   : > { %v1382_v24 = vsub.f32 %v3822_v18, %v3825_v19  ;;  %1486 = vst.msk [vmem:[#allocation4] sm:$0xff] %vm1416_vm2, %v3825_v19  ;;  %1390 = vperm.xlu1 %2852, %v3825_v19  }
 0x906   : > { %v1379_v42 = vpop.xlane.xlu0 %1378 }
 0x907   : > { %v3835_v63 = vmax.f32 %v3827_v41, %v1379_v42 }
 0x909   : > { %v1383_v30 = vsub.f32 %v3827_v41, %v3835_v63  ;;  %1487 = vst.msk [vmem:[#allocation4 + $0x8] sm:$0xff] %vm1416_vm2, %v3835_v63  ;;  %1395 = vperm.xlu1 %2852, %v3835_v63  }
 0x90a   : > { %v1436_v44 = vpop.permute.xlu0 %1435 }
 0x90b   : > { %2567 = vmatpush3.bf16.msra.mxu1 %v1436_v44  ;;  %v1386_v18 = vmul.f32 1.442695, %v1383_v30 }
 0x90c   : > { %2572 = vmatprep.subr.bf16.mxu1 %v3219_v27 }
 0x90d   : > { %1497 = vrot.lane.b32.xlu1 %v3561_v20, %s3223_s12 }
 0x911   : > { %1495 = vrot.lane.b32.xlu1 %v2855_v28, %s3223_s12  ;;  %v3898_v28 = vld [vmem:[#allocation4 + $0x30] sm:$0xff] }
 0x915   : > { %1680 = vrot.lane.b32.xlu1 %v3561_v20, %s3224_s17 }
 0x919   : > { %1678 = vrot.lane.b32.xlu1 %v2856_v48, %s3224_s17 }
 0x91d   : > { %1863 = vrot.lane.b32.xlu1 %v3561_v20, %s3225_s4 }
 0x921   : > { %1861 = vrot.lane.b32.xlu1 %v2857_v21, %s3225_s4 }
 0x980   : > { %v1391_v51 = vpop.permute.xlu1 %1390 }
 0x981   : > { %v1398_v52 = vsub.f32 %v1364_v32, %v1391_v51  ;;  %v1548_v32 = vld [vmem:[#allocation4 + $0x18] sm:$0xff] }
 0x983   : > { %v1400_v35 = vmul.f32 1.442695, %v1398_v52  ;;  %v3904_v52 = vld [vmem:[#allocation4 + $0x38] sm:$0xff] }
 0x984   : > { %v1396_v53 = vpop.permute.xlu1 %1395 }
 0x985   : > { %v1399_v54 = vsub.f32 %v1367_v37, %v1396_v53  ;;  %2858 = vpow2.f32 %v1400_v35  ;;  %v1730_v37 = vld [vmem:[#allocation4 + $0x20] sm:$0xff] }
 0x987   : > { %v1402_v39 = vmul.f32 1.442695, %v1399_v54 }
 0x988   : > { %v1498_v31 = vpop.permute.xlu1 %1497 }
 0x989   : > { %2860 = vpow2.f32 %v1402_v39  ;;  %v1503_v33 = vsel %vm1323_vm15, %v1498_v31, 0 }
 0x98c   : > { %v1496_v58 = vpop.permute.xlu1 %1495 }
 0x990   : > { %v1681_v3 = vpop.permute.xlu1 %1680 }
 0x991   : > { %v1686_v55 = vsel %vm1323_vm15, %v1681_v3, 0 }
 0x992   : > { %v3846_v61 = vpop.eup %2858 }
 0x993   : > { %v1408_v31 = vsel %vm1373_vm1, %v3846_v61, 0.0 }
 0x994   : > { %v1679_v4 = vpop.permute.xlu1 %1678 }
 0x996   : > { %v3848_v1 = vpop.eup %2860 }
 0x997   : > { %v1433_v62 = vpack.c.bf16 %v3848_v1, %v3846_v61  ;;  %v1411_v19 = vsel %vm1373_vm1, %v3848_v1, 0.0 }
 0x998   : > { %v1864_v56 = vpop.permute.xlu1 %1863 }
 0x999   : > { %2569 = vmatmul.mubr.msk.bf16.vlgmr.msra.gmra.mxu1 %vm1373_vm1, %v1433_v62  ;;  %v1869_v57 = vsel %vm1323_vm15, %v1864_v56, 0 }
 0x99a   : > { %2573 = vmatpush3.bf16.xpose.msra.mxu1 %v1503_v33  ;;  %2574 = vmatprep.mubr.msk.bf16.mxu1 %vm3220_vm0, %v3219_v27 }
 0x99b   : > { %2584 = vmatprep.subr.bf16.mxu1 %v3219_v27 }
 0x99c   : > { %v1862_v59 = vpop.permute.xlu1 %1861 }
 0x9a1   : > { %2575 = vmatmul.mubr.msk.bf16.vlgmr.msra.gmra.mxu1 %vm1323_vm15, %v1496_v58  ;;  %v1384_v58 = vmul.f32 1.442695, %v1382_v24 }
 0x9a2   : > { %2585 = vmatpush3.bf16.xpose.msra.mxu1 %v1686_v55  ;;  %2586 = vmatprep.mubr.msk.bf16.mxu1 %vm3220_vm0, %v3219_v27 }
 0x9a3   : > { %2596 = vmatprep.subr.bf16.mxu1 %v3219_v27  ;;  %2862 = vpow2.f32 %v1384_v58 }
 0x9a9   : > { %2587 = vmatmul.mubr.msk.bf16.vlgmr.msra.gmra.mxu1 %vm1323_vm15, %v1679_v4 }
 0x9aa   : > { %2597 = vmatpush3.bf16.xpose.msra.mxu1 %v1869_v57  ;;  %2598 = vmatprep.mubr.msk.bf16.mxu1 %vm3220_vm0, %v3219_v27 }
 0x9b0   : > { %v3927_v55 = vpop.eup %2862 }
 0x9b1   : > { %2599 = vmatmul.mubr.msk.bf16.vlgmr.msra.gmra.mxu1 %vm1323_vm15, %v1862_v59 }
 0xa59   : > { %v3867_v60 = vpop.f32.mrf.mxu1 }
 0xa5b   : > { %v2570_v2 = vpop.f32.mrf.mxu1 }
 0xa5d   : > { %v3869_v5 = vpop.f32.mrf.mxu1 }
 0xa5f   : > { %v2571_v6 = vpop.f32.mrf.mxu1 }
 0xa61   : > { %v3871_v7 = vpop.f32.mrf.mxu1 }
 0xa62   : > { %v1549_v22 = vsel %vm1373_vm1, %v3871_v7, -inf }
 0xa63   : > { %1550 = vmax.xlane.f32.xlu0 %v1549_v22  ;;  %v2576_v8 = vpop.f32.mrf.mxu1 }
 0xa65   : > { %v3875_v10 = vpop.f32.mrf.mxu1 }
 0xa66   : > { %v1552_v12 = vsel %vm1373_vm1, %v3875_v10, -inf }
 0xa67   : > { %1553 = vmax.xlane.f32.xlu1 %v1552_v12  ;;  %v2577_v43 = vpop.f32.mrf.mxu1 }
 0xa69   : > { %v3879_v45 = vpop.f32.mrf.mxu1 }
 0xa6a   : > { %v1732_v13 = vsel %vm1373_vm1, %v3879_v45, -inf }
 0xa6b   : > { %1733 = vmax.xlane.f32.xlu0 %v1732_v13  ;;  %v2588_v47 = vpop.f32.mrf.mxu1 }
 0xa6d   : > { %v3883_v16 = vpop.f32.mrf.mxu1 }
 0xa6e   : > { %v1735_v46 = vsel %vm1373_vm1, %v3883_v16, -inf }
 0xa6f   : > { %1736 = vmax.xlane.f32.xlu0 %v1735_v46  ;;  %v2589_v49 = vpop.f32.mrf.mxu1 }
 0xa71   : > { %v3887_v9 = vpop.f32.mrf.mxu1 }
 0xa72   : > { %v1915_v0 = vsel %vm1373_vm1, %v3887_v9, -inf }
 0xa73   : > { %v2600_v23 = vpop.f32.mrf.mxu1  ;;  %1916 = vmax.xlane.f32.xlu1 %v1915_v0 }
 0xa75   : > { %v3891_v17 = vpop.f32.mrf.mxu1 }
 0xa76   : > { %v1918_v25 = vsel %vm1373_vm1, %v3891_v17, -inf }
 0xa77   : > { %1919 = vmax.xlane.f32.xlu0 %v1918_v25  ;;  %v2601_v50 = vpop.f32.mrf.mxu1 }
 0xaec   : > { %v1551_v29 = vpop.xlane.xlu0 %1550 }
 0xaed   : > { %v1555_v11 = vmax.f32 %v1547_v26, %v1551_v29 }
 0xaef   : > { %1669 = vst.msk [vmem:[#allocation4 + $0x10] sm:$0xff] %vm1416_vm2, %v1555_v11  ;;  %1565 = vperm.xlu1 %2852, %v1555_v11   ;;  %v1557_v33 = vsub.f32 %v1547_v26, %v1555_v11 }
 0xaf0   : > { %v1554_v34 = vpop.xlane.xlu1 %1553 }
 0xaf1   : > { %v1556_v36 = vmax.f32 %v1548_v32, %v1554_v34  ;;  %v1559_v62 = vmul.f32 1.442695, %v1557_v33  ;;  %v1405_v33 = vld [vmem:[#allocation5 + $0x8] sm:$0xff] }
 0xaf3   : > { %v1558_v14 = vsub.f32 %v1548_v32, %v1556_v36  ;;  %1670 = vst.msk [vmem:[#allocation4 + $0x18] sm:$0xff] %vm1416_vm2, %v1556_v36  ;;  %1570 = vperm.xlu0 %2853, %v1556_v36   ;;  %2864 = vpow2.f32 %v1559_v62 }
 0xaf4   : > { %v1734_v15 = vpop.xlane.xlu0 %1733 }
 0xaf5   : > { %v1738_v38 = vmax.f32 %v1730_v37, %v1734_v15  ;;  %v1561_v24 = vmul.f32 1.442695, %v1558_v14 }
 0xaf7   : > { %1852 = vst.msk [vmem:[#allocation4 + $0x20] sm:$0xff] %vm1416_vm2, %v1738_v38  ;;  %1748 = vperm.xlu1 %2852, %v1738_v38   ;;  %v1740_v3 = vsub.f32 %v1730_v37, %v1738_v38 }
 0xaf8   : > { %v1737_v42 = vpop.xlane.xlu0 %1736 }
 0xaf9   : > { %v1739_v44 = vmax.f32 %v1731_v40, %v1737_v42  ;;  %v1742_v4 = vmul.f32 1.442695, %v1740_v3  ;;  %v1404_v42 = vld [vmem:[#allocation5] sm:$0xff] }
 0xafb   : > { %v1741_v48 = vsub.f32 %v1731_v40, %v1739_v44  ;;  %1853 = vst.msk [vmem:[#allocation4 + $0x28] sm:$0xff] %vm1416_vm2, %v1739_v44  ;;  %1753 = vperm.xlu1 %2852, %v1739_v44   ;;  %2866 = vpow2.f32 %v1742_v4  ;;  %v1406_v44 = vmul.f32 %v3927_v55, %v1404_v42 }
 0xafc   : > { %v1917_v21 = vpop.xlane.xlu1 %1916  ;;  %2868 = vpow2.f32 %v1386_v18  ;;  %v1420_v18 = vld [vmem:[#allocation3 + $0x8] sm:$0xff] }
 0xafd   : > { %v3902_v51 = vmax.f32 %v3898_v28, %v1917_v21  ;;  %2870 = vpow2.f32 %v1561_v24  ;;  %v1744_v56 = vmul.f32 1.442695, %v1741_v48 }
 0xaff   : > { %1609 = vrot.lane.b32.xlu1 %v3561_v20, %s3226_s13  ;;  %v1923_v35 = vsub.f32 %v3898_v28, %v3902_v51  ;;  %2035 = vst.msk [vmem:[#allocation4 + $0x30] sm:$0xff] %vm1416_vm2, %v3902_v51  ;;  %2872 = vpow2.f32 %v1744_v56 }
 0xb00   : > { %v1920_v53 = vpop.xlane.xlu0 %1919 }
 0xb01   : > { %v3912_v54 = vmax.f32 %v3904_v52, %v1920_v53  ;;  %v1419_v53 = vld [vmem:[#allocation3] sm:$0xff] }
 0xb03   : > { %v1924_v39 = vsub.f32 %v3904_v52, %v3912_v54  ;;  %2036 = vst.msk [vmem:[#allocation4 + $0x38] sm:$0xff] %vm1416_vm2, %v3912_v54  ;;  %1931 = vperm.xlu1 %2852, %v3902_v51  }
 0xb07   : > { %1936 = vperm.xlu1 %2852, %v3912_v54  }
 0xb0b   : > { %1792 = vrot.lane.b32.xlu1 %v3561_v20, %s3227_s14 }
 0xb0f   : > { %1975 = vrot.lane.b32.xlu1 %v3561_v20, %s3228_s29  ;;  %v3930_v20 = vpop.eup %2864 }
 0xb10   : > { %v3933_v61 = vpop.eup %2866 }
 0xb11   : > { %v3941_v57 = vpop.eup %2868 }
 0xb12   : > { %1409 = vadd.xlane.f32.xlu0 %v1408_v31  ;;  %v3944_v59 = vpop.eup %2870  ;;  %v1407_v62 = vmul.f32 %v3941_v57, %v1405_v33 }
 0xb13   : > { %v3947_v2 = vpop.eup %2872 }
 0xb28   : > { %1423 = vperm.xlu0 %2853, %v3927_v55  }
 0xb2c   : > { %1598 = vperm.xlu0 %2853, %v3930_v20  }
 0xb30   : > { %1781 = vperm.xlu0 %2853, %v3933_v61  }
 0xb33   : > { %1412 = vadd.xlane.f32.xlu1 %v1411_v19 }
 0xb44   : > { %1428 = vperm.xlu1 %2852, %v3941_v57  }
 0xb48   : > { %1603 = vperm.xlu1 %2852, %v3944_v59  }
 0xb4c   : > { %1786 = vperm.xlu1 %2852, %v3947_v2  }
 0xb6a   : > { %v1566_v41 = vpop.permute.xlu1 %1565 }
 0xb6b   : > { %v1573_v63 = vsub.f32 %v3871_v7, %v1566_v41 }
 0xb6d   : > { %v1575_v30 = vmul.f32 1.442695, %v1573_v63 }
 0xb6e   : > { %v1571_v1 = vpop.permute.xlu0 %1570 }
 0xb6f   : > { %2874 = vpow2.f32 %v1575_v30  ;;  %v1574_v6 = vsub.f32 %v3875_v10, %v1571_v1 }
 0xb71   : > { %v1577_v22 = vmul.f32 1.442695, %v1574_v6  ;;  %v1581_v6 = vld [vmem:[#allocation5 + $0x18] sm:$0xff] }
 0xb72   : > { %v1749_v8 = vpop.permute.xlu1 %1748 }
 0xb73   : > { %2876 = vpow2.f32 %v1577_v22  ;;  %v1756_v12 = vsub.f32 %v3879_v45, %v1749_v8  ;;  %v1583_v8 = vmul.f32 %v3944_v59, %v1581_v6 }
 0xb75   : > { %v1758_v43 = vmul.f32 1.442695, %v1756_v12 }
 0xb76   : > { %v1754_v13 = vpop.permute.xlu1 %1753 }
 0xb77   : > { %2878 = vpow2.f32 %v1758_v43  ;;  %v1757_v47 = vsub.f32 %v3883_v16, %v1754_v13 }
 0xb79   : > { %v1760_v46 = vmul.f32 1.442695, %v1757_v47 }
 0xb7a   : > { %v1610_v49 = vpop.permute.xlu1 %1609 }
 0xb7b   : > { %2880 = vpow2.f32 %v1760_v46  ;;  %2579 = vmatpush3.bf16.msra.mxu0 %v1610_v49  ;;  %v1764_v46 = vld [vmem:[#allocation5 + $0x28] sm:$0xff] }
 0xb7c   : > { %v2875_v7 = vpop.eup %2874  ;;  %2590 = vmatprep.subr.bf16.mxu0 %v3219_v27 }
 0xb7d   : > { %v1584_v0 = vsel %vm1373_vm1, %v2875_v7, 0.0 }
 0xb7e   : > { %v1932_v10 = vpop.permute.xlu1 %1931  ;;  %1585 = vadd.xlane.f32.xlu0 %v1584_v0 }
 0xb7f   : > { %v1939_v23 = vsub.f32 %v3887_v9, %v1932_v10 }
 0xb80   : > { %v2877_v25 = vpop.eup %2876 }
 0xb81   : > { %v1587_v45 = vsel %vm1373_vm1, %v2877_v25, 0.0  ;;  %v1608_v50 = vpack.c.bf16 %v2877_v25, %v2875_v7  ;;  %v1941_v26 = vmul.f32 1.442695, %v1939_v23 }
 0xb82   : > { %v1937_v29 = vpop.permute.xlu1 %1936  ;;  %1588 = vadd.xlane.f32.xlu1 %v1587_v45 }
 0xb83   : > { %v1940_v16 = vsub.f32 %v3891_v17, %v1937_v29  ;;  %2581 = vmatmul.mubr.msk.bf16.vlgmr.msra.gmra.mxu0 %vm1373_vm1, %v1608_v50  ;;  %2882 = vpow2.f32 %v1941_v26 }
 0xb84   : > { %v2879_v11 = vpop.eup %2878  ;;  %2592 = vmatprep.mubr.msk.bf16.mxu0 %vm3220_vm0, %v3219_v27 }
 0xb85   : > { %v1943_v32 = vmul.f32 1.442695, %v1940_v16  ;;  %v1767_v34 = vsel %vm1373_vm1, %v2879_v11, 0.0 }
 0xb86   : > { %1768 = vadd.xlane.f32.xlu0 %v1767_v34  ;;  %v1793_v9 = vpop.permute.xlu1 %1792  ;;  %v1925_v34 = vmul.f32 1.442695, %v1923_v35 }
 0xb87   : > { %2884 = vpow2.f32 %v1943_v32  ;;  %2591 = vmatpush3.bf16.msra.mxu0 %v1793_v9  ;;  %v1927_v9 = vmul.f32 1.442695, %v1924_v39 }
 0xb88   : > { %v2881_v36 = vpop.eup %2880  ;;  %2602 = vmatprep.subr.bf16.mxu0 %v3219_v27  ;;  %2886 = vpow2.f32 %v1925_v34 }
 0xb89   : > { %v1770_v37 = vsel %vm1373_vm1, %v2881_v36, 0.0  ;;  %v1791_v17 = vpack.c.bf16 %v2881_v36, %v2879_v11  ;;  %2888 = vpow2.f32 %v1927_v9 }
 0xb8a   : > { %1771 = vadd.xlane.f32.xlu1 %v1770_v37  ;;  %v1976_v14 = vpop.permute.xlu1 %1975 }
 0xb8b   : > { %2593 = vmatmul.mubr.msk.bf16.vlgmr.msra.gmra.mxu0 %vm1373_vm1, %v1791_v17 }
 0xb8c   : > { %2603 = vmatpush3.bf16.msra.mxu0 %v1976_v14  ;;  %2604 = vmatprep.mubr.msk.bf16.mxu0 %vm3220_vm0, %v3219_v27 }
 0xb90   : > { %v3968_v15 = vpop.eup %2882 }
 0xb91   : > { %v1950_v32 = vsel %vm1373_vm1, %v3968_v15, 0.0 }
 0xb94   : > { %v3970_v38 = vpop.eup %2884 }
 0xb95   : > { %v1974_v40 = vpack.c.bf16 %v3970_v38, %v3968_v15  ;;  %v1953_v36 = vsel %vm1373_vm1, %v3970_v38, 0.0  ;;  %v2887_v37 = vpop.eup %2886 }
 0xb96   : > { %v2889_v17 = vpop.eup %2888 }
 0xb97   : > { %2605 = vmatmul.mubr.msk.bf16.vlgmr.msra.gmra.mxu0 %vm1373_vm1, %v1974_v40 }
 0xb9b   : > { %v1410_v48 = vpop.xlane.xlu0 %1409 }
 0xb9c   : > { %v1414_v21 = vadd.f32 %v1410_v48, %v1406_v44  ;;  %v1946_v48 = vld [vmem:[#allocation5 + $0x30] sm:$0xff] }
 0xb9e   : > { %1417 = vst.msk [vmem:[#allocation5] sm:$0xff] %vm1416_vm2, %v1414_v21  ;;  %v1948_v21 = vmul.f32 %v2887_v37, %v1946_v48 }
 0xba3   : > { %v1424_v31 = vpop.permute.xlu0 %1423 }
 0xba4   : > { %v1431_v58 = vmul.f32 %v1424_v31, %v1419_v53 }
 0xba6   : > { %v1482_v27 = vadd.f32 %v3867_v60, %v1431_v58  ;;  %v1580_v60 = vld [vmem:[#allocation5 + $0x10] sm:$0xff] }
 0xba7   : > { %v1599_v56 = vpop.permute.xlu0 %1598  ;;  %v1582_v30 = vmul.f32 %v3930_v20, %v1580_v60  ;;  %v1766_v20 = vmul.f32 %v3947_v2, %v1764_v46 }
 0xba8   : > { %1484 = vst.msk [vmem:[#allocation3] sm:$0xff] %vm1323_vm15, %v1482_v27 }
 0xbab   : > { %v3983_v63 = vpop.permute.xlu0 %1781 }
 0xbaf   : > { %v1594_v28 = vld [vmem:[#allocation3] sm:$0xff] }
 0xbb0   : > { %v1606_v51 = vmul.f32 %v1599_v56, %v1594_v28 }
 0xbbc   : > { %v1413_v3 = vpop.xlane.xlu1 %1412 }
 0xbbd   : > { %v1415_v4 = vadd.f32 %v1413_v3, %v1407_v62 }
 0xbbf   : > { %1418 = vst.msk [vmem:[#allocation5 + $0x8] sm:$0xff] %vm1416_vm2, %v1415_v4  ;;  %v1947_v4 = vld [vmem:[#allocation5 + $0x38] sm:$0xff] }
 0xbc0   : > { %v1429_v55 = vpop.permute.xlu1 %1428 }
 0xbc1   : > { %v1432_v19 = vmul.f32 %v1429_v55, %v1420_v18 }
 0xbc3   : > { %v1483_v24 = vadd.f32 %v3869_v5, %v1432_v19  ;;  %v1763_v5 = vld [vmem:[#allocation5 + $0x20] sm:$0xff] }
 0xbc4   : > { %v1604_v41 = vpop.permute.xlu1 %1603  ;;  %v1765_v13 = vmul.f32 %v3933_v61, %v1763_v5 }
 0xbc5   : > { %1485 = vst.msk [vmem:[#allocation3 + $0x8] sm:$0xff] %vm1323_vm15, %v1483_v24  ;;  %v1949_v24 = vmul.f32 %v2889_v17, %v1947_v4 }
 0xbc8   : > { %v3986_v1 = vpop.permute.xlu1 %1786 }
 0xbcc   : > { %v1595_v35 = vld [vmem:[#allocation3 + $0x8] sm:$0xff] }
 0xbcd   : > { %v1607_v54 = vmul.f32 %v1604_v41, %v1595_v35 }
 0xc07   : > { %v1586_v57 = vpop.xlane.xlu0 %1585 }
 0xc08   : > { %v1590_v22 = vadd.f32 %v1586_v57, %v1582_v30 }
 0xc0a   : > { %1592 = vst.msk [vmem:[#allocation5 + $0x10] sm:$0xff] %vm1416_vm2, %v1590_v22 }
 0xc0b   : > { %v1589_v12 = vpop.xlane.xlu1 %1588 }
 0xc0c   : > { %v1591_v43 = vadd.f32 %v1589_v12, %v1583_v8 }
 0xc0e   : > { %1593 = vst.msk [vmem:[#allocation5 + $0x18] sm:$0xff] %vm1416_vm2, %v1591_v43 }
 0xc0f   : > { %v1769_v47 = vpop.xlane.xlu0 %1768 }
 0xc10   : > { %v1773_v49 = vadd.f32 %v1769_v47, %v1765_v13 }
 0xc12   : > { %1775 = vst.msk [vmem:[#allocation5 + $0x20] sm:$0xff] %vm1416_vm2, %v1773_v49 }
 0xc13   : > { %v1772_v7 = vpop.xlane.xlu1 %1771 }
 0xc14   : > { %v1774_v0 = vadd.f32 %v1772_v7, %v1766_v20 }
 0xc16   : > { %1776 = vst.msk [vmem:[#allocation5 + $0x28] sm:$0xff] %vm1416_vm2, %v1774_v0 }
 0xc43   : > { %v1649_v10 = vpop.f32.mrf.mxu0 }
 0xc44   : > { %1658 = vrot.lane.b32.xlu0 %v1649_v10, %s3229_s6 }
 0xc45   : > { %v2582_v59 = vpop.f32.mrf.mxu0 }
 0xc47   : > { %v1652_v23 = vpop.f32.mrf.mxu0 }
 0xc48   : > { %1660 = vrot.lane.b32.xlu1 %v1652_v23, %s3229_s6 }
 0xc49   : > { %v2583_v25 = vpop.f32.mrf.mxu0 }
 0xc4b   : > { %v1832_v45 = vpop.f32.mrf.mxu0 }
 0xc4d   : > { %v2594_v61 = vpop.f32.mrf.mxu0 }
 0xc4f   : > { %v1835_v50 = vpop.f32.mrf.mxu0 }
 0xc50   : > { %1843 = vrot.lane.b32.xlu1 %v1835_v50, %s3230_s16 }
 0xc51   : > { %v2595_v26 = vpop.f32.mrf.mxu0 }
 0xc57   : > { %v2015_v29 = vpop.f32.mrf.mxu0 }
 0xc59   : > { %v2606_v16 = vpop.f32.mrf.mxu0 }
 0xc5b   : > { %v2018_v2 = vpop.f32.mrf.mxu0 }
 0xc5d   : > { %v2607_v11 = vpop.f32.mrf.mxu0 }
 0xc63   : > { %1951 = vadd.xlane.f32.xlu0 %v1950_v32 }
 0xc74   : > { %1954 = vadd.xlane.f32.xlu1 %v1953_v36 }
 0xc79   : > { %1841 = vrot.lane.b32.xlu0 %v1832_v45, %s3230_s16 }
 0xc7d   : > { %1964 = vperm.xlu0 %2853, %v2887_v37  }
 0xc81   : > { %2024 = vrot.lane.b32.xlu0 %v2015_v29, %s3231_s18 }
 0xc85   : > { %1969 = vperm.xlu1 %2852, %v2889_v17  }
 0xc89   : > { %2026 = vrot.lane.b32.xlu1 %v2018_v2, %s3231_s18 }
 0xcb6   : > { %v1659_v14 = vpop.permute.xlu0 %1658 }
 0xcb7   : > { %v1664_v52 = vadd.f32 %v1659_v14, %v1606_v51 }
 0xcb9   : > { %1667 = vst.msk [vmem:[#allocation3] sm:$0xff] %vm1666_vm3, %v1664_v52 }
 0xcba   : > { %v1661_v39 = vpop.permute.xlu1 %1660 }
 0xcbb   : > { %v1665_v15 = vadd.f32 %v1661_v39, %v1607_v54 }
 0xcbd   : > { %1668 = vst.msk [vmem:[#allocation3 + $0x8] sm:$0xff] %vm1666_vm3, %v1665_v15 }
 0xcc0   : > { %v1777_v31 = vld [vmem:[#allocation3] sm:$0xff] }
 0xcc1   : > { %v1789_v27 = vmul.f32 %v3983_v63, %v1777_v31 }
 0xcc2   : > { %v1844_v42 = vpop.permute.xlu1 %1843 }
 0xcc4   : > { %v1778_v38 = vld [vmem:[#allocation3 + $0x8] sm:$0xff] }
 0xcc5   : > { %v1790_v40 = vmul.f32 %v3986_v1, %v1778_v38 }
 0xcc7   : > { %v1848_v44 = vadd.f32 %v1844_v42, %v1790_v40 }
 0xcc9   : > { %1851 = vst.msk [vmem:[#allocation3 + $0x8] sm:$0xff] %vm1849_vm4, %v1848_v44 }
 0xcd0   : > { %v1961_v1 = vld [vmem:[#allocation3 + $0x8] sm:$0xff] }
 0xcec   : > { %v1952_v53 = vpop.xlane.xlu0 %1951 }
 0xced   : > { %v1956_v58 = vadd.f32 %v1952_v53, %v1948_v21 }
 0xcef   : > { %1958 = vst.msk [vmem:[#allocation5 + $0x30] sm:$0xff] %vm1416_vm2, %v1956_v58 }
 0xcf0   : > { %v1842_v33 = vpop.permute.xlu0 %1841 }
 0xcf1   : > { %v1847_v62 = vadd.f32 %v1842_v33, %v1789_v27 }
 0xcf3   : > { %1850 = vst.msk [vmem:[#allocation3] sm:$0xff] %vm1849_vm4, %v1847_v62 }
 0xcf8   : > { %v1965_v3 = vpop.permute.xlu0 %1964 }
 0xcfa   : > { %v1960_v18 = vld [vmem:[#allocation3] sm:$0xff] }
 0xcfb   : > { %v1972_v55 = vmul.f32 %v1965_v3, %v1960_v18 }
 0xcfc   : > { %v2025_v19 = vpop.permute.xlu0 %2024 }
 0xcfd   : > { %v2030_v56 = vadd.f32 %v2025_v19, %v1972_v55  ;;  %v1955_v41 = vpop.xlane.xlu1 %1954 }
 0xcfe   : > { %v1957_v60 = vadd.f32 %v1955_v41, %v1949_v24 }
 0xcff   : > { %2033 = vst.msk [vmem:[#allocation3] sm:$0xff] %vm2032_vm5, %v2030_v56 }
 0xd00   : > { %1959 = vst.msk [vmem:[#allocation5 + $0x38] sm:$0xff] %vm1416_vm2, %v1957_v60 }
 0xd01   : > { %v1970_v30 = vpop.permute.xlu1 %1969 }
 0xd02   : > { %v1973_v57 = vmul.f32 %v1970_v30, %v1961_v1 }
 0xd05   : > { %v2027_v63 = vpop.permute.xlu1 %2026 }
 0xd06   : > { %v2031_v6 = vadd.f32 %v2027_v63, %v1973_v57 }
 0xd08   : > { %2034 = vst.msk [vmem:[#allocation3 + $0x8] sm:$0xff] %vm2032_vm5, %v2031_v6 }
 0xd09 PF: > { %s4168_s10 = sld [smem:[#allocation22_spill]] }
 0xd0f   : > { %p2438_p12 = scmp.ne.s32.totalorder %s4168_s10, 1 }
 0xd10   : > { %s4169_s2 = sld [smem:[#allocation35_spill]] (!%p2438_p12) }
 0xd11   : > { %2040 = sbr.rel (%p2438_p12) target bundleno = 3738 (0xe9a), region = 84 }
 0xd16   : > { %v2063_v22 = vld [vmem:[#allocation5 + $0x10] sm:$0xff]  ;;  %v2041_v8 = vld [vmem:[#allocation5] sm:$0xff]  ;;  %v2064_v12 = vld [vmem:[#allocation5 + $0x18] sm:$0xff]  ;;  %v3232_v5 = vmov 0   ;;  %v3233_v50 = vmov 0.0   ;;  %vm3234_vm6 = vmmov 0  }
 0xd17   : > { %2891 = vset.pattern.permute.xlu1 %v3232_v5  ;;  %2890 = vset.pattern.permute.xlu0 %v3232_v5  ;;  %2894 = vrcp.f32 %v2063_v22  ;;  %v2042_v43 = vld [vmem:[#allocation5 + $0x8] sm:$0xff]  ;;  %v2085_v47 = vld [vmem:[#allocation5 + $0x20] sm:$0xff]  ;;  %v2108_v46 = vld [vmem:[#allocation5 + $0x38] sm:$0xff]  ;;  %vm2059_vm7 = vcmask 64512   ;;  %vm2081_vm8 = vcmask 130112   ;;  %vm2103_vm9 = vcmask 195712  }
 0xd18   : > { %2896 = vrcp.f32 %v2041_v8  ;;  %v2086_v13 = vld [vmem:[#allocation5 + $0x28] sm:$0xff]  ;;  %v2107_v49 = vld [vmem:[#allocation5 + $0x30] sm:$0xff]  ;;  %2608 = vmatprep.subr.bf16.mxu0 %v3233_v50  ;;  %2612 = vmatprep.mubr.msk.bf16.mxu0 %vm3234_vm6, %v3233_v50  ;;  %v2893_v26 = vld [vmem:[#allocation14] sm:$0xff]   ;;  %vm2125_vm10 = vcmask 261312   ;;  %vm2154_vm11 = vcmask 261120   ;;  %vm2207_vm12 = vcmask 257024  }
 0xd19   : > { %2898 = vrcp.f32 %v2064_v12  ;;  %v2892_v61 = vld [vmem:[#allocation14 + $0x8] sm:$0xff]   ;;  %v2045_v29 = vld [vmem:[#allocation3] sm:$0xff]  ;;  %v2046_v11 = vld [vmem:[#allocation3 + $0x8] sm:$0xff] }
 0xd1a   : > { %2900 = vrcp.f32 %v2042_v43  ;;  %2609 = vmatpush3.bf16.msra.mxu0 %v2892_v61  ;;  %v2439_v27 = vld [vmem:[%s4169_s2] ss:$0 sm:$0xff] }
 0xd1b   : > { %2902 = vrcp.f32 %v2086_v13  ;;  %2610 = vmatprep.subr.bf16.mxu0 %v3233_v50 }
 0xd1c   : > { %2904 = vrcp.f32 %v2085_v47 }
 0xd1d   : > { %2906 = vrcp.f32 %v2108_v46 }
 0xd1e   : > { %2908 = vrcp.f32 %v2107_v49  ;;  %2611 = vmatpush3.bf16.msra.mxu0 %v2893_v26 }
 0xd24   : > { %v2895_v20 = vpop.eup %2894 }
 0xd25   : > { %v2897_v7 = vpop.eup %2896  ;;  %2071 = vperm.xlu1 %2891, %v2895_v20  }
 0xd26   : > { %v2899_v0 = vpop.eup %2898  ;;  %2049 = vperm.xlu0 %2890, %v2897_v7  }
 0xd27   : > { %v2901_v10 = vpop.eup %2900 }
 0xd28   : > { %v2903_v59 = vpop.eup %2902 }
 0xd29   : > { %2076 = vperm.xlu1 %2891, %v2899_v0   ;;  %v2905_v23 = vpop.eup %2904 }
 0xd2a   : > { %2054 = vperm.xlu0 %2890, %v2901_v10   ;;  %v2907_v25 = vpop.eup %2906 }
 0xd2b   : > { %v2909_v45 = vpop.eup %2908 }
 0xd2d   : > { %2098 = vperm.xlu1 %2891, %v2903_v59  }
 0xd2e   : > { %2093 = vperm.xlu0 %2890, %v2905_v23  }
 0xd31   : > { %2120 = vperm.xlu1 %2891, %v2907_v25  }
 0xd32   : > { %2115 = vperm.xlu0 %2890, %v2909_v45  }
 0xda0   : > { %v2072_v9 = vpop.permute.xlu1 %2071 }
 0xda1   : > { %v2050_v16 = vpop.permute.xlu0 %2049 }
 0xda2   : > { %v2057_v2 = vmul.f32 %v2050_v16, %v2045_v29 }
 0xda4   : > { %2060 = vst.msk [vmem:[#allocation3] sm:$0xff] %vm2059_vm7, %v2057_v2  ;;  %v2077_v17 = vpop.permute.xlu1 %2076 }
 0xda5   : > { %v2055_v32 = vpop.permute.xlu0 %2054 }
 0xda6   : > { %v2058_v34 = vmul.f32 %v2055_v32, %v2046_v11 }
 0xda8   : > { %2061 = vst.msk [vmem:[#allocation3 + $0x8] sm:$0xff] %vm2059_vm7, %v2058_v34  ;;  %v2099_v54 = vpop.permute.xlu1 %2098 }
 0xda9   : > { %v2094_v14 = vpop.permute.xlu0 %2093 }
 0xdab   : > { %v2067_v36 = vld [vmem:[#allocation3] sm:$0xff] }
 0xdac   : > { %v2079_v37 = vmul.f32 %v2072_v9, %v2067_v36  ;;  %v2121_v44 = vpop.permute.xlu1 %2120 }
 0xdad   : > { %v2116_v40 = vpop.permute.xlu0 %2115 }
 0xdae   : > { %2082 = vst.msk [vmem:[#allocation3] sm:$0xff] %vm2081_vm8, %v2079_v37 }
 0xdaf   : > { %v2068_v28 = vld [vmem:[#allocation3 + $0x8] sm:$0xff] }
 0xdb0   : > { %v2080_v51 = vmul.f32 %v2077_v17, %v2068_v28 }
 0xdb2   : > { %2083 = vst.msk [vmem:[#allocation3 + $0x8] sm:$0xff] %vm2081_vm8, %v2080_v51 }
 0xdb5   : > { %v2089_v35 = vld [vmem:[#allocation3] sm:$0xff] }
 0xdb6   : > { %v2101_v52 = vmul.f32 %v2094_v14, %v2089_v35 }
 0xdb8   : > { %2104 = vst.msk [vmem:[#allocation3] sm:$0xff] %vm2103_vm9, %v2101_v52 }
 0xdb9   : > { %v2090_v39 = vld [vmem:[#allocation3 + $0x8] sm:$0xff] }
 0xdba   : > { %v2102_v15 = vmul.f32 %v2099_v54, %v2090_v39 }
 0xdbc   : > { %2105 = vst.msk [vmem:[#allocation3 + $0x8] sm:$0xff] %vm2103_vm9, %v2102_v15 }
 0xdbf   : > { %v2111_v38 = vld [vmem:[#allocation3] sm:$0xff] }
 0xdc0   : > { %v2123_v42 = vmul.f32 %v2116_v40, %v2111_v38 }
 0xdc2   : > { %2126 = vst.msk [vmem:[#allocation3] sm:$0xff] %vm2125_vm10, %v2123_v42 }
 0xdc3   : > { %v2112_v48 = vld [vmem:[#allocation3 + $0x8] sm:$0xff] }
 0xdc4   : > { %v2124_v21 = vmul.f32 %v2121_v44, %v2112_v48 }
 0xdc6   : > { %2127 = vst.msk [vmem:[#allocation3 + $0x8] sm:$0xff] %vm2125_vm10, %v2124_v21 }
 0xdc9   : > { %v2128_v53 = vld [vmem:[#allocation3] sm:$0xff] }
 0xdcd   : > { %v2129_v31 = vld [vmem:[#allocation3 + $0x8] sm:$0xff] }
 0xdce   : > { %v2130_v58 = vpack.c.bf16 %v2129_v31, %v2128_v53 }
 0xdd0   : > { %2613 = vmatmul.mubr.msk.bf16.vlgmr.msra.gmra.mxu0 %vm2154_vm11, %v2130_v58 }
 0xe90   : > { %v2192_v33 = vpop.f32.mrf.mxu0 }
 0xe91   : > { %v2193_v62 = vadd.f32 %v2439_v27, %v2192_v33 }
 0xe92   : > { %v2614_v3 = vpop.f32.mrf.mxu0 }
 0xe93   : > { %v2453_v4 = vpack.c.bf16 %v2193_v62, %v2193_v62 }
 0xe94   : > { %v2195_v18 = vpop.f32.mrf.mxu0 }
 0xe95   : > { %2208 = vst.msk [vmem:[%s3536_s19] sm:$0xf] %vm2207_vm12, %v2453_v4  ;;  %v2196_v55 = vadd.f32 %v2439_v27, %v2195_v18 }
 0xe96   : > { %v2615_v19 = vpop.f32.mrf.mxu0 }
 0xe97   : > { %v2454_v24 = vpack.c.bf16 %v2196_v55, %v2196_v55 }
 0xe99   : > { %2209 = vst.msk [vmem:[%s3536_s19 + $0x4] sm:$0xf] %vm2207_vm12, %v2454_v24 }
 0xe9a PF: > { %s4170_s21 = sld [smem:[#allocation23_spill]]  ;;  %s2226_s4 = sshll.u32 %s3536_s19, 4  ;;  %s4018_s4 = int_to_ptr.vmem [resolvable:$true] %s2226_s4 }
 0xe9b   : > { %s4171_s28 = sld [smem:[#allocation24_spill]]  ;;  %s2211_s10 = scalar_lea.sflag [#allocation8], %s3503_s24 }
 0xe9c   : > { %s4173_s16 = sld [smem:[#allocation36_spill]]  ;;  %s3044_s15 = scalar_lea.vmem %s4018_s4, 128 }
 0xe9d   : > { %p3045_p11 = scmp.ne.s32.totalorder %s4018_s4, %s3044_s15  ;;  %s3235_s3 = smov [#allocation15]  }
 0xe9e   : > { %s3048_s19 = sshll.u32 %s3235_s3, 4  ;;  %s3049_s19 = int_to_ptr.vmem [resolvable:$false] %s3048_s19 }
 0xe9f   : > { %p3046_p7 = pnand %p3045_p11, %p3430_p5  ;;  %s3050_s2 = scalar_lea.vmem %s3049_s19, 256 }
 0xea0   : > { %s2446_s12 = sshll.u32 %s4170_s21, 1  ;;  %p3051_p0 = scmp.lt.s32.totalorder %s4018_s4, %s3049_s19 }
 0xea1   : > { %s2447_s17 = sshll.u32 %s4171_s28, 2  ;;  %p3047_p3 = pneg %p3046_p7 }
 0xea2   : > { %s2223_s13 = sadd.s32 %s2447_s17, %s2446_s12  ;;  %p3052_p8 = scmp.lt.s32.totalorder %s3050_s2, %s3044_s15 }
 0xea3   : > { %s2448_s14 = sshll.u32 %s2223_s13, 6 }
 0xea4   : > { %s4023_s18 = scalar_lea.hbm %s4173_s16, %s2448_s14  ;;  %p3053_p4 = por %p3052_p8, %p3051_p0 }
 0xea6   : > { %p3054_p10 = pnand %p3053_p4, %p3047_p3 }
 0xea8   : > { %3057 = shalt.err (!%p3054_p10)
}
 0xea9   : > { %s3058_s21 = scalar_lea.hbm %s4023_s18, 128  ;;  %s3062_s17 = scalar_lea.hbm %s4173_s16, 512 }
 0xeaa   : > { %p3059_p2 = scmp.ne.s32.totalorder %s4023_s18, %s3058_s21  ;;  %p3063_p13 = scmp.lt.s32.totalorder %s4023_s18, %s4173_s16 }
 0xeab   : > { %p3064_p9 = scmp.lt.s32.totalorder %s3062_s17, %s3058_s21 }
 0xeac   : > { %p3060_p6 = pnand %p3059_p2, %p3430_p5 }
 0xead   : > { %p3065_p12 = por %p3064_p9, %p3063_p13 }
 0xeae   : > { %p3061_p1 = pneg %p3060_p6 }
 0xeb0   : > { %p3066_p11 = pnand %p3065_p12, %p3061_p1 }
 0xeb2   : > { %3069 = shalt.err (!%p3066_p11)
}
 0xeb3   : > { %s3236_s29 = smov 64   ;;  %s3237_s6 = smov 4  }
 0xeb4   : > { %2632 = dma.vmem_to_hbm [thread:$0]  (%p3430_p5), %s4018_s4, 128, %s4023_s18, %s2211_s10, %s3236_s29, %s3236_s29, %s3237_s6  }
 0xeb5 PF: > { %s4174_s15 = sld [smem:[#allocation21_spill]]  ;;  %p2662_p7 = scmp.ge.s32.totalorder %s3192_s9, 2 }
 0xeb6   : > { %s4175_s3 = sld [smem:[#allocation28_spill]] }
 0xebb   : > { %s2241_s19 = sand.u32 1, %s4174_s15  }
 0xebc   : > { %p4176_p3 = scmp.ne.s32.totalorder %s4175_s3, 0  ;;  %s2242_s2 = scalar_lea.sflag [#allocation8], %s2241_s19 }
 0xebe   : > { %p2652_p0 = pnand %p2662_p7, %p4176_p3 }
 0xec0   : > { %p2653_p8 = pneg %p2652_p0 }
 0xec2   : > { %3139 = dma.done.wait (%p2653_p8), %s2242_s2, 128  }
 0xec3   : > { %3141 = vsyncadd (%p2653_p8), %s2242_s2, 4294967168  ;;  %s26_s9 = sadd.s32 1, %s3192_s9   ;;  %s4178_s5 = sld [smem:[#allocation29_spill]] }
 0xec4   : > { %p4053_p4 = scmp.ge.s32.totalorder %s26_s9, 10   ;;  %s4179_s4 = sld [smem:[#allocation31_spill]] }
 0xec5   : > { %s4181_s21 = smov %s3148_s22  ;;  %s4182_s22 = smov %s3152_s23 }
 0xec6   : > { %s4183_s23 = smov %s3476_s11  ;;  %s4184_s24 = smov %s3160_s25 }
 0xec7   : > { %s4185_s25 = smov %s3164_s26  ;;  %s4186_s26 = smov %s3451_s27 }
 0xec8   : > { %s4187_s27 = smov %s3180_s30  ;;  %s4188_s28 = smov %s3184_s7 }
 0xec9   : > { %s4189_s29 = smov %s3188_s8  ;;  %s4190_s30 = smov %s4178_s5 }
 0xeca   : > { %s4191_s7 = smov %s4179_s4  ;;  %s4192_s8 = smov %s4202_s20 }
 0xecb   :  { %25 = sbr.rel (!%p4053_p4) target bundleno = 19 (0x13), region = 149 }
 0xed0   :  { %2247 = vsyncpa [#allocation7], 1 }
 0xed1   :  { %2249 = vsyncpa [#allocation7 + $0x1], 1 }
 0xed2   :  { %2250 = vsyncpa [#allocation10], 1 }
 0xed3   :  { %2252 = vsyncpa [#allocation10 + $0x1], 1 }
 0xed4   :  { %2253 = vsyncpa [#allocation13], 1 }
 0xed5   :  { %2254 = vsyncpa [#allocation8], 1 }
 0xed6   :  { %2256 = vsyncpa [#allocation8 + $0x1], 1 }

</bundles_post_ra>
